<compile_context>
chip_gen: v7x
topology: tpu7x:2x2x1
jax: 0.10.0
libtpu: 0.0.40
codegen_flags: <defaults>
</compile_context>

<pallas_src>
import jax
import jax.numpy as jnp
from jax.experimental import pallas as pl
from jax.experimental.pallas import tpu as pltpu


def _make_conv_kernel(K, H, W, Hp, Wp, H_out, W_out, S_cols, C, stride):
    """Fused reflection-pad + conv kernel, one image per grid step."""
    pad = K // 2

    def reflect(i, n):
        # PyTorch ReflectionPad2d index map (single reflection, pad < n).
        if i < 0:
            return -i
        if i >= n:
            return 2 * (n - 1) - i
        return i

    def kernel(x_ref, w_ref, b_ref, o_ref, img_ref, patch_ref):
        x_img = x_ref[0]                                   # (C, H, W) f32

        # ---- Reflection pad, entirely in VMEM (no extra HBM pass). --------
        # Column pad first (lane-axis concat of 2*pad+1 static slices).
        if pad > 0:
            left = [x_img[:, :, pad - j:pad - j + 1] for j in range(pad)]
            right = [x_img[:, :, W - 2 - j:W - 1 - j] for j in range(pad)]
            xc = jnp.concatenate(left + [x_img] + right, axis=2)  # (C, H, Wp)
        else:
            xc = x_img
        # Row pad + spatial flatten: padded row r lives at lane offset r*Wp of
        # the flat (C, Hp*Wp) scratch.  Unrolled over the Hp (static) rows.
        for r in range(Hp):
            img_ref[:, pl.ds(r * Wp, Wp)] = xc[:, reflect(r - pad, H), :]

        img = img_ref[...]                                 # (C, Hp*Wp) f32

        # ---- Fused patch operand: stack the K*K shifted taps along the
        #      contraction axis -> (K*K*C, S_cols).  Each tap is one static
        #      (strided if stride>1) lane slice of the flat padded image. ----
        t = 0
        for ki in range(K):
            for kj in range(K):
                off = ki * Wp + kj
                if stride == 1:
                    tap = jax.lax.slice(img, (0, off), (C, off + S_cols))
                else:
                    tap = jax.lax.slice(
                        img, (0, off),
                        (C, off + stride * (S_cols - 1) + 1),
                        (1, stride))
                patch_ref[pl.ds(t * C, C), :] = tap
                t += 1

        patch = patch_ref[...].astype(jnp.bfloat16)        # (K*K*C, S_cols)

        # ---- One MXU matmul, f32 accumulation, + bias. ---------------------
        # (OC, K*K*C) x (K*K*C, S_cols) -> (OC, S_cols)
        y = jnp.dot(w_ref[...], patch, preferred_element_type=jnp.float32)
        y = y + b_ref[...]                                 # (OC, 1) broadcast

        # ---- Compact store: output row ho occupies wide columns
        #      [ho*Wp, ho*Wp + W_out).  For large W_out (>=128) these are
        #      lane-dense row stores; junk columns are never written. --------
        for ho in range(H_out):
            o_ref[0, :, ho, :] = y[:, ho * Wp: ho * Wp + W_out].astype(o_ref.dtype)

    return kernel


def conv_layer_forward(x, weight, bias, stride):
    """ConvLayer forward.

    x      : (N, C, H, W)  float32  (NCHW, as in PyTorch)
    weight : (OC, C, K, K) float32
    bias   : (OC,)         float32
    """
    N, C, H, W = x.shape
    OC, _, K, _ = weight.shape
    pad = K // 2
    if pad >= H or pad >= W:
        raise ValueError(
            f"ReflectionPad2d({pad}) requires spatial dims > {pad}, got {(H, W)}")

    Hp, Wp = H + 2 * pad, W + 2 * pad
    H_out = (Hp - K) // stride + 1
    W_out = (Wp - K) // stride + 1
    # Wide working width (row stride Wp), trimmed so the furthest tap read is
    # exactly the last padded pixel -> no zero tail needed.
    S_cols = (H_out - 1) * Wp + W_out
    KKC = K * K * C

    # Weight taps stacked on the contraction axis:
    #   w_fused[oc, (ki*K + kj)*C + c] = weight[oc, c, ki, kj]
    w_fused = jnp.transpose(weight, (0, 2, 3, 1)).reshape(OC, KKC)
    w_fused = w_fused.astype(jnp.bfloat16)
    b2 = bias.reshape(OC, 1).astype(jnp.float32)

    kernel = _make_conv_kernel(K=K, H=H, W=W, Hp=Hp, Wp=Wp, H_out=H_out,
                               W_out=W_out, S_cols=S_cols, C=C, stride=stride)

    # VMEM budget derived from the actual block bytes: 2x (double-buffered
    # pipeline) for the HBM-backed blocks, plus the two VMEM scratches, plus
    # headroom for Mosaic internal scratch.  Clamped to 64 MiB so the same
    # limit is valid on v7x (64 MiB/TC) as well as v5e/v6e (128 MiB).
    blk_in = C * H * W * 4
    blk_w = OC * KKC * 2
    blk_b = OC * 128 * 4                      # (OC, 1) pads to a 128-lane tile
    blk_out = OC * H_out * W_out * 4
    scratch_bytes = (C * Hp * Wp + KKC * S_cols) * 4
    vmem_limit = 2 * (blk_in + blk_w + blk_b + blk_out) + scratch_bytes + (8 << 20)
    vmem_limit = int(min(64 << 20, max(16 << 20, vmem_limit)))

    out = pl.pallas_call(
        kernel,
        out_shape=jax.ShapeDtypeStruct((N, OC, H_out, W_out), jnp.float32),
        grid_spec=pltpu.PrefetchScalarGridSpec(
            num_scalar_prefetch=0,
            grid=(N,),                                      # one image per step
            in_specs=[
                pl.BlockSpec((1, C, H, W), lambda n: (n, 0, 0, 0)),   # raw image
                pl.BlockSpec((OC, KKC), lambda n: (0, 0)),            # weights
                pl.BlockSpec((OC, 1), lambda n: (0, 0)),              # bias
            ],
            out_specs=pl.BlockSpec((1, OC, H_out, W_out),
                                   lambda n: (n, 0, 0, 0)),
            scratch_shapes=[
                pltpu.VMEM((C, Hp * Wp), jnp.float32),     # flat padded image
                pltpu.VMEM((KKC, S_cols), jnp.float32),    # fused patch operand
            ],
        ),
        compiler_params=pltpu.CompilerParams(
            # "parallel" lets v7x split the per-image axis across both TCs.
            dimension_semantics=("parallel",),
            vmem_limit_bytes=vmem_limit,
        ),
    )(x, w_fused, b2)
    return out


def _reference_forward(x, weight, bias, stride):
    """Plain-JAX reference (reflection pad + conv) for a sanity check."""
    K = weight.shape[2]
    pad = K // 2
    x_pad = jnp.pad(x, ((0, 0), (0, 0), (pad, pad), (pad, pad)), mode="reflect")
    out = jax.lax.conv_general_dilated(
        x_pad, weight, window_strides=(stride, stride), padding="VALID",
        dimension_numbers=("NCHW", "OIHW", "NCHW"))
    return out + bias.reshape(1, -1, 1, 1)


if __name__ == "__main__":
    # ConvLayer(in_channels=4, out_channels=8, kernel_size=3, stride=1)
    N, C_in, H, W = 2, 4, 16, 16
    C_out, K, stride = 8, 3, 1

    key = jax.random.PRNGKey(0)
    kx, kw, kb = jax.random.split(key, 3)

    x = jax.random.normal(kx, (N, C_in, H, W), dtype=jnp.float32)
    # Deterministic Conv2d-style init (uniform in +-1/sqrt(fan_in)).
    fan_in = C_in * K * K
    bound = 1.0 / (fan_in ** 0.5)
    weight = jax.random.uniform(kw, (C_out, C_in, K, K), jnp.float32,
                                minval=-bound, maxval=bound)
    bias = jax.random.uniform(kb, (C_out,), jnp.float32,
                              minval=-bound, maxval=bound)

    out = conv_layer_forward(x, weight, bias, stride)
    out = jax.block_until_ready(out)

    # Reference with the same bf16 quantization of the multiply operands the
    # kernel uses (bf16 products, f32 accumulation) -> tight tolerance.
    xq = x.astype(jnp.bfloat16).astype(jnp.float32)
    wq = weight.astype(jnp.bfloat16).astype(jnp.float32)
    ref_q = _reference_forward(xq, wq, bias, stride)
    # Full-precision reference -> loose tolerance (bf16 input quantization).
    ref_f = _reference_forward(x, weight, bias, stride)

    assert out.shape == ref_f.shape, (out.shape, ref_f.shape)
    err_q = float(jnp.max(jnp.abs(out - ref_q)))
    err_f = float(jnp.max(jnp.abs(out - ref_f)))
    assert err_q < 1e-3, err_q
    assert err_f < 1.5e-1, err_f

    print("KERNEL_OK")
</pallas_src>

<mosaic_0001>
module attributes {stable_mosaic.version = 11 : i64} {
  func.func @kernel(%arg0: i32, %arg1: memref<1x4x16x16xf32, #tpu.memory_space<vmem>>, %arg2: memref<8x36xbf16, #tpu.memory_space<vmem>>, %arg3: memref<8x1xf32, #tpu.memory_space<vmem>>, %arg4: memref<1x8x16x16xf32, #tpu.memory_space<vmem>>, %arg5: memref<4x324xf32, #tpu.memory_space<vmem>>, %arg6: memref<36x286xf32, #tpu.memory_space<vmem>>) attributes {dimension_semantics = [#tpu.dimension_semantics<parallel>], iteration_bounds = array<i64: 2>, scalar_prefetch = 0 : i64, scratch_operands = 2 : i64, tpu.core_type = #tpu.core_type<tc>, window_params = [{transform_indices = @transform_0, window_bounds = array<i64: 1, 4, 16, 16>}, {pipeline_mode = #tpu.pipeline_mode<synchronous>, transform_indices = @transform_1, window_bounds = array<i64: 8, 36>}, {pipeline_mode = #tpu.pipeline_mode<synchronous>, transform_indices = @transform_2, window_bounds = array<i64: 8, 1>}, {transform_indices = @transform_3, window_bounds = array<i64: 1, 8, 16, 16>}]} {
    %c0 = arith.constant 0 : index
    %c0_0 = arith.constant 0 : index
    %c0_1 = arith.constant 0 : index
    %c0_2 = arith.constant 0 : index
    %0 = vector.load %arg1[%c0, %c0_0, %c0_1, %c0_2] : memref<1x4x16x16xf32, #tpu.memory_space<vmem>>, vector<1x4x16x16xf32>
    %1 = vector.shape_cast %0 : vector<1x4x16x16xf32> to vector<4x16x16xf32>
    %2 = vector.extract_strided_slice %1 {offsets = [0, 0, 1], sizes = [4, 16, 1], strides = [1, 1, 1]} : vector<4x16x16xf32> to vector<4x16x1xf32>
    %3 = vector.extract_strided_slice %1 {offsets = [0, 0, 14], sizes = [4, 16, 1], strides = [1, 1, 1]} : vector<4x16x16xf32> to vector<4x16x1xf32>
    %4 = tpu.concatenate %2, %1, %3 in 2 : vector<4x16x1xf32>, vector<4x16x16xf32>, vector<4x16x1xf32> -> vector<4x16x18xf32>
    %5 = vector.extract_strided_slice %4 {offsets = [0, 1, 0], sizes = [4, 1, 18], strides = [1, 1, 1]} : vector<4x16x18xf32> to vector<4x1x18xf32>
    %6 = vector.shape_cast %5 : vector<4x1x18xf32> to vector<4x18xf32>
    %c0_3 = arith.constant 0 : index
    %c0_4 = arith.constant 0 : index
    %7 = vector.load %arg5[%c0_3, %c0_4] : memref<4x324xf32, #tpu.memory_space<vmem>>, vector<4x18xf32>
    tpu.vector_store %arg5[%c0_3, %c0_4], %6 {strides = array<i32>} : memref<4x324xf32, #tpu.memory_space<vmem>>, vector<4x18xf32>,
    %8 = vector.extract_strided_slice %4 {offsets = [0, 0, 0], sizes = [4, 1, 18], strides = [1, 1, 1]} : vector<4x16x18xf32> to vector<4x1x18xf32>
    %9 = vector.shape_cast %8 : vector<4x1x18xf32> to vector<4x18xf32>
    %c0_5 = arith.constant 0 : index
    %c18 = arith.constant 18 : index
    %10 = vector.load %arg5[%c0_5, %c18] : memref<4x324xf32, #tpu.memory_space<vmem>>, vector<4x18xf32>
    tpu.vector_store %arg5[%c0_5, %c18], %9 {strides = array<i32>} : memref<4x324xf32, #tpu.memory_space<vmem>>, vector<4x18xf32>,
    %11 = vector.extract_strided_slice %4 {offsets = [0, 1, 0], sizes = [4, 1, 18], strides = [1, 1, 1]} : vector<4x16x18xf32> to vector<4x1x18xf32>
    %12 = vector.shape_cast %11 : vector<4x1x18xf32> to vector<4x18xf32>
    %c0_6 = arith.constant 0 : index
    %c36 = arith.constant 36 : index
    %13 = vector.load %arg5[%c0_6, %c36] : memref<4x324xf32, #tpu.memory_space<vmem>>, vector<4x18xf32>
    tpu.vector_store %arg5[%c0_6, %c36], %12 {strides = array<i32>} : memref<4x324xf32, #tpu.memory_space<vmem>>, vector<4x18xf32>,
    %14 = vector.extract_strided_slice %4 {offsets = [0, 2, 0], sizes = [4, 1, 18], strides = [1, 1, 1]} : vector<4x16x18xf32> to vector<4x1x18xf32>
    %15 = vector.shape_cast %14 : vector<4x1x18xf32> to vector<4x18xf32>
    %c0_7 = arith.constant 0 : index
    %c54 = arith.constant 54 : index
    %16 = vector.load %arg5[%c0_7, %c54] : memref<4x324xf32, #tpu.memory_space<vmem>>, vector<4x18xf32>
    tpu.vector_store %arg5[%c0_7, %c54], %15 {strides = array<i32>} : memref<4x324xf32, #tpu.memory_space<vmem>>, vector<4x18xf32>,
    %17 = vector.extract_strided_slice %4 {offsets = [0, 3, 0], sizes = [4, 1, 18], strides = [1, 1, 1]} : vector<4x16x18xf32> to vector<4x1x18xf32>
    %18 = vector.shape_cast %17 : vector<4x1x18xf32> to vector<4x18xf32>
    %c0_8 = arith.constant 0 : index
    %c72 = arith.constant 72 : index
    %19 = vector.load %arg5[%c0_8, %c72] : memref<4x324xf32, #tpu.memory_space<vmem>>, vector<4x18xf32>
    tpu.vector_store %arg5[%c0_8, %c72], %18 {strides = array<i32>} : memref<4x324xf32, #tpu.memory_space<vmem>>, vector<4x18xf32>,
    %20 = vector.extract_strided_slice %4 {offsets = [0, 4, 0], sizes = [4, 1, 18], strides = [1, 1, 1]} : vector<4x16x18xf32> to vector<4x1x18xf32>
    %21 = vector.shape_cast %20 : vector<4x1x18xf32> to vector<4x18xf32>
    %c0_9 = arith.constant 0 : index
    %c90 = arith.constant 90 : index
    %22 = vector.load %arg5[%c0_9, %c90] : memref<4x324xf32, #tpu.memory_space<vmem>>, vector<4x18xf32>
    tpu.vector_store %arg5[%c0_9, %c90], %21 {strides = array<i32>} : memref<4x324xf32, #tpu.memory_space<vmem>>, vector<4x18xf32>,
    %23 = vector.extract_strided_slice %4 {offsets = [0, 5, 0], sizes = [4, 1, 18], strides = [1, 1, 1]} : vector<4x16x18xf32> to vector<4x1x18xf32>
    %24 = vector.shape_cast %23 : vector<4x1x18xf32> to vector<4x18xf32>
    %c0_10 = arith.constant 0 : index
    %c108 = arith.constant 108 : index
    %25 = vector.load %arg5[%c0_10, %c108] : memref<4x324xf32, #tpu.memory_space<vmem>>, vector<4x18xf32>
    tpu.vector_store %arg5[%c0_10, %c108], %24 {strides = array<i32>} : memref<4x324xf32, #tpu.memory_space<vmem>>, vector<4x18xf32>,
    %26 = vector.extract_strided_slice %4 {offsets = [0, 6, 0], sizes = [4, 1, 18], strides = [1, 1, 1]} : vector<4x16x18xf32> to vector<4x1x18xf32>
    %27 = vector.shape_cast %26 : vector<4x1x18xf32> to vector<4x18xf32>
    %c0_11 = arith.constant 0 : index
    %c126 = arith.constant 126 : index
    %28 = vector.load %arg5[%c0_11, %c126] : memref<4x324xf32, #tpu.memory_space<vmem>>, vector<4x18xf32>
    tpu.vector_store %arg5[%c0_11, %c126], %27 {strides = array<i32>} : memref<4x324xf32, #tpu.memory_space<vmem>>, vector<4x18xf32>,
    %29 = vector.extract_strided_slice %4 {offsets = [0, 7, 0], sizes = [4, 1, 18], strides = [1, 1, 1]} : vector<4x16x18xf32> to vector<4x1x18xf32>
    %30 = vector.shape_cast %29 : vector<4x1x18xf32> to vector<4x18xf32>
    %c0_12 = arith.constant 0 : index
    %c144 = arith.constant 144 : index
    %31 = vector.load %arg5[%c0_12, %c144] : memref<4x324xf32, #tpu.memory_space<vmem>>, vector<4x18xf32>
    tpu.vector_store %arg5[%c0_12, %c144], %30 {strides = array<i32>} : memref<4x324xf32, #tpu.memory_space<vmem>>, vector<4x18xf32>,
    %32 = vector.extract_strided_slice %4 {offsets = [0, 8, 0], sizes = [4, 1, 18], strides = [1, 1, 1]} : vector<4x16x18xf32> to vector<4x1x18xf32>
    %33 = vector.shape_cast %32 : vector<4x1x18xf32> to vector<4x18xf32>
    %c0_13 = arith.constant 0 : index
    %c162 = arith.constant 162 : index
    %34 = vector.load %arg5[%c0_13, %c162] : memref<4x324xf32, #tpu.memory_space<vmem>>, vector<4x18xf32>
    tpu.vector_store %arg5[%c0_13, %c162], %33 {strides = array<i32>} : memref<4x324xf32, #tpu.memory_space<vmem>>, vector<4x18xf32>,
    %35 = vector.extract_strided_slice %4 {offsets = [0, 9, 0], sizes = [4, 1, 18], strides = [1, 1, 1]} : vector<4x16x18xf32> to vector<4x1x18xf32>
    %36 = vector.shape_cast %35 : vector<4x1x18xf32> to vector<4x18xf32>
    %c0_14 = arith.constant 0 : index
    %c180 = arith.constant 180 : index
    %37 = vector.load %arg5[%c0_14, %c180] : memref<4x324xf32, #tpu.memory_space<vmem>>, vector<4x18xf32>
    tpu.vector_store %arg5[%c0_14, %c180], %36 {strides = array<i32>} : memref<4x324xf32, #tpu.memory_space<vmem>>, vector<4x18xf32>,
    %38 = vector.extract_strided_slice %4 {offsets = [0, 10, 0], sizes = [4, 1, 18], strides = [1, 1, 1]} : vector<4x16x18xf32> to vector<4x1x18xf32>
    %39 = vector.shape_cast %38 : vector<4x1x18xf32> to vector<4x18xf32>
    %c0_15 = arith.constant 0 : index
    %c198 = arith.constant 198 : index
    %40 = vector.load %arg5[%c0_15, %c198] : memref<4x324xf32, #tpu.memory_space<vmem>>, vector<4x18xf32>
    tpu.vector_store %arg5[%c0_15, %c198], %39 {strides = array<i32>} : memref<4x324xf32, #tpu.memory_space<vmem>>, vector<4x18xf32>,
    %41 = vector.extract_strided_slice %4 {offsets = [0, 11, 0], sizes = [4, 1, 18], strides = [1, 1, 1]} : vector<4x16x18xf32> to vector<4x1x18xf32>
    %42 = vector.shape_cast %41 : vector<4x1x18xf32> to vector<4x18xf32>
    %c0_16 = arith.constant 0 : index
    %c216 = arith.constant 216 : index
    %43 = vector.load %arg5[%c0_16, %c216] : memref<4x324xf32, #tpu.memory_space<vmem>>, vector<4x18xf32>
    tpu.vector_store %arg5[%c0_16, %c216], %42 {strides = array<i32>} : memref<4x324xf32, #tpu.memory_space<vmem>>, vector<4x18xf32>,
    %44 = vector.extract_strided_slice %4 {offsets = [0, 12, 0], sizes = [4, 1, 18], strides = [1, 1, 1]} : vector<4x16x18xf32> to vector<4x1x18xf32>
    %45 = vector.shape_cast %44 : vector<4x1x18xf32> to vector<4x18xf32>
    %c0_17 = arith.constant 0 : index
    %c234 = arith.constant 234 : index
    %46 = vector.load %arg5[%c0_17, %c234] : memref<4x324xf32, #tpu.memory_space<vmem>>, vector<4x18xf32>
    tpu.vector_store %arg5[%c0_17, %c234], %45 {strides = array<i32>} : memref<4x324xf32, #tpu.memory_space<vmem>>, vector<4x18xf32>,
    %47 = vector.extract_strided_slice %4 {offsets = [0, 13, 0], sizes = [4, 1, 18], strides = [1, 1, 1]} : vector<4x16x18xf32> to vector<4x1x18xf32>
    %48 = vector.shape_cast %47 : vector<4x1x18xf32> to vector<4x18xf32>
    %c0_18 = arith.constant 0 : index
    %c252 = arith.constant 252 : index
    %49 = vector.load %arg5[%c0_18, %c252] : memref<4x324xf32, #tpu.memory_space<vmem>>, vector<4x18xf32>
    tpu.vector_store %arg5[%c0_18, %c252], %48 {strides = array<i32>} : memref<4x324xf32, #tpu.memory_space<vmem>>, vector<4x18xf32>,
    %50 = vector.extract_strided_slice %4 {offsets = [0, 14, 0], sizes = [4, 1, 18], strides = [1, 1, 1]} : vector<4x16x18xf32> to vector<4x1x18xf32>
    %51 = vector.shape_cast %50 : vector<4x1x18xf32> to vector<4x18xf32>
    %c0_19 = arith.constant 0 : index
    %c270 = arith.constant 270 : index
    %52 = vector.load %arg5[%c0_19, %c270] : memref<4x324xf32, #tpu.memory_space<vmem>>, vector<4x18xf32>
    tpu.vector_store %arg5[%c0_19, %c270], %51 {strides = array<i32>} : memref<4x324xf32, #tpu.memory_space<vmem>>, vector<4x18xf32>,
    %53 = vector.extract_strided_slice %4 {offsets = [0, 15, 0], sizes = [4, 1, 18], strides = [1, 1, 1]} : vector<4x16x18xf32> to vector<4x1x18xf32>
    %54 = vector.shape_cast %53 : vector<4x1x18xf32> to vector<4x18xf32>
    %c0_20 = arith.constant 0 : index
    %c288 = arith.constant 288 : index
    %55 = vector.load %arg5[%c0_20, %c288] : memref<4x324xf32, #tpu.memory_space<vmem>>, vector<4x18xf32>
    tpu.vector_store %arg5[%c0_20, %c288], %54 {strides = array<i32>} : memref<4x324xf32, #tpu.memory_space<vmem>>, vector<4x18xf32>,
    %56 = vector.extract_strided_slice %4 {offsets = [0, 14, 0], sizes = [4, 1, 18], strides = [1, 1, 1]} : vector<4x16x18xf32> to vector<4x1x18xf32>
    %57 = vector.shape_cast %56 : vector<4x1x18xf32> to vector<4x18xf32>
    %c0_21 = arith.constant 0 : index
    %c306 = arith.constant 306 : index
    %58 = vector.load %arg5[%c0_21, %c306] : memref<4x324xf32, #tpu.memory_space<vmem>>, vector<4x18xf32>
    tpu.vector_store %arg5[%c0_21, %c306], %57 {strides = array<i32>} : memref<4x324xf32, #tpu.memory_space<vmem>>, vector<4x18xf32>,
    %c0_22 = arith.constant 0 : index
    %c0_23 = arith.constant 0 : index
    %59 = vector.load %arg5[%c0_22, %c0_23] : memref<4x324xf32, #tpu.memory_space<vmem>>, vector<4x324xf32>
    %60 = vector.extract_strided_slice %59 {offsets = [0, 0], sizes = [4, 286], strides = [1, 1]} : vector<4x324xf32> to vector<4x286xf32>
    %c0_24 = arith.constant 0 : index
    %c0_25 = arith.constant 0 : index
    %61 = vector.load %arg6[%c0_24, %c0_25] : memref<36x286xf32, #tpu.memory_space<vmem>>, vector<4x286xf32>
    tpu.vector_store %arg6[%c0_24, %c0_25], %60 {strides = array<i32>} : memref<36x286xf32, #tpu.memory_space<vmem>>, vector<4x286xf32>,
    %62 = vector.extract_strided_slice %59 {offsets = [0, 1], sizes = [4, 286], strides = [1, 1]} : vector<4x324xf32> to vector<4x286xf32>
    %c4 = arith.constant 4 : index
    %c0_26 = arith.constant 0 : index
    %63 = vector.load %arg6[%c4, %c0_26] : memref<36x286xf32, #tpu.memory_space<vmem>>, vector<4x286xf32>
    tpu.vector_store %arg6[%c4, %c0_26], %62 {strides = array<i32>} : memref<36x286xf32, #tpu.memory_space<vmem>>, vector<4x286xf32>,
    %64 = vector.extract_strided_slice %59 {offsets = [0, 2], sizes = [4, 286], strides = [1, 1]} : vector<4x324xf32> to vector<4x286xf32>
    %c8 = arith.constant 8 : index
    %c0_27 = arith.constant 0 : index
    %65 = vector.load %arg6[%c8, %c0_27] : memref<36x286xf32, #tpu.memory_space<vmem>>, vector<4x286xf32>
    tpu.vector_store %arg6[%c8, %c0_27], %64 {strides = array<i32>} : memref<36x286xf32, #tpu.memory_space<vmem>>, vector<4x286xf32>,
    %66 = vector.extract_strided_slice %59 {offsets = [0, 18], sizes = [4, 286], strides = [1, 1]} : vector<4x324xf32> to vector<4x286xf32>
    %c12 = arith.constant 12 : index
    %c0_28 = arith.constant 0 : index
    %67 = vector.load %arg6[%c12, %c0_28] : memref<36x286xf32, #tpu.memory_space<vmem>>, vector<4x286xf32>
    tpu.vector_store %arg6[%c12, %c0_28], %66 {strides = array<i32>} : memref<36x286xf32, #tpu.memory_space<vmem>>, vector<4x286xf32>,
    %68 = vector.extract_strided_slice %59 {offsets = [0, 19], sizes = [4, 286], strides = [1, 1]} : vector<4x324xf32> to vector<4x286xf32>
    %c16 = arith.constant 16 : index
    %c0_29 = arith.constant 0 : index
    %69 = vector.load %arg6[%c16, %c0_29] : memref<36x286xf32, #tpu.memory_space<vmem>>, vector<4x286xf32>
    tpu.vector_store %arg6[%c16, %c0_29], %68 {strides = array<i32>} : memref<36x286xf32, #tpu.memory_space<vmem>>, vector<4x286xf32>,
    %70 = vector.extract_strided_slice %59 {offsets = [0, 20], sizes = [4, 286], strides = [1, 1]} : vector<4x324xf32> to vector<4x286xf32>
    %c20 = arith.constant 20 : index
    %c0_30 = arith.constant 0 : index
    %71 = vector.load %arg6[%c20, %c0_30] : memref<36x286xf32, #tpu.memory_space<vmem>>, vector<4x286xf32>
    tpu.vector_store %arg6[%c20, %c0_30], %70 {strides = array<i32>} : memref<36x286xf32, #tpu.memory_space<vmem>>, vector<4x286xf32>,
    %72 = vector.extract_strided_slice %59 {offsets = [0, 36], sizes = [4, 286], strides = [1, 1]} : vector<4x324xf32> to vector<4x286xf32>
    %c24 = arith.constant 24 : index
    %c0_31 = arith.constant 0 : index
    %73 = vector.load %arg6[%c24, %c0_31] : memref<36x286xf32, #tpu.memory_space<vmem>>, vector<4x286xf32>
    tpu.vector_store %arg6[%c24, %c0_31], %72 {strides = array<i32>} : memref<36x286xf32, #tpu.memory_space<vmem>>, vector<4x286xf32>,
    %74 = vector.extract_strided_slice %59 {offsets = [0, 37], sizes = [4, 286], strides = [1, 1]} : vector<4x324xf32> to vector<4x286xf32>
    %c28 = arith.constant 28 : index
    %c0_32 = arith.constant 0 : index
    %75 = vector.load %arg6[%c28, %c0_32] : memref<36x286xf32, #tpu.memory_space<vmem>>, vector<4x286xf32>
    tpu.vector_store %arg6[%c28, %c0_32], %74 {strides = array<i32>} : memref<36x286xf32, #tpu.memory_space<vmem>>, vector<4x286xf32>,
    %76 = vector.extract_strided_slice %59 {offsets = [0, 38], sizes = [4, 286], strides = [1, 1]} : vector<4x324xf32> to vector<4x286xf32>
    %c32 = arith.constant 32 : index
    %c0_33 = arith.constant 0 : index
    %77 = vector.load %arg6[%c32, %c0_33] : memref<36x286xf32, #tpu.memory_space<vmem>>, vector<4x286xf32>
    tpu.vector_store %arg6[%c32, %c0_33], %76 {strides = array<i32>} : memref<36x286xf32, #tpu.memory_space<vmem>>, vector<4x286xf32>,
    %c0_34 = arith.constant 0 : index
    %c0_35 = arith.constant 0 : index
    %78 = vector.load %arg6[%c0_34, %c0_35] : memref<36x286xf32, #tpu.memory_space<vmem>>, vector<36x286xf32>
    %79 = arith.truncf %78 : vector<36x286xf32> to vector<36x286xbf16>
    %c0_36 = arith.constant 0 : index
    %c0_37 = arith.constant 0 : index
    %80 = vector.load %arg2[%c0_36, %c0_37] : memref<8x36xbf16, #tpu.memory_space<vmem>>, vector<8x36xbf16>
    %cst = arith.constant dense<0.000000e+00> : vector<8x286xf32>
    %81 = tpu.matmul %80, %79, %cst {dimension_numbers = #tpu.dot_dimension_numbers<[1], [0], [0], [1], [0, 0, 1, 1], [], []>} : vector<8x36xbf16>, vector<36x286xbf16>, vector<8x286xf32> -> vector<8x286xf32>
    %c0_38 = arith.constant 0 : index
    %c0_39 = arith.constant 0 : index
    %82 = vector.load %arg3[%c0_38, %c0_39] : memref<8x1xf32, #tpu.memory_space<vmem>>, vector<8x1xf32>
    %83 = vector.broadcast %82 : vector<8x1xf32> to vector<8x286xf32>
    %84 = arith.addf %81, %83 : vector<8x286xf32>
    %85 = vector.extract_strided_slice %84 {offsets = [0, 0], sizes = [8, 16], strides = [1, 1]} : vector<8x286xf32> to vector<8x16xf32>
    %c0_40 = arith.constant 0 : index
    %c0_41 = arith.constant 0 : index
    %c0_42 = arith.constant 0 : index
    %c0_43 = arith.constant 0 : index
    %86 = vector.load %arg4[%c0_40, %c0_41, %c0_42, %c0_43] : memref<1x8x16x16xf32, #tpu.memory_space<vmem>>, vector<1x8x1x16xf32>
    %87 = vector.shape_cast %86 : vector<1x8x1x16xf32> to vector<8x16xf32>
    %88 = vector.shape_cast %85 : vector<8x16xf32> to vector<1x8x1x16xf32>
    tpu.vector_store %arg4[%c0_40, %c0_41, %c0_42, %c0_43], %88 {strides = array<i32>} : memref<1x8x16x16xf32, #tpu.memory_space<vmem>>, vector<1x8x1x16xf32>,
    %89 = vector.extract_strided_slice %84 {offsets = [0, 18], sizes = [8, 16], strides = [1, 1]} : vector<8x286xf32> to vector<8x16xf32>
    %c0_44 = arith.constant 0 : index
    %c0_45 = arith.constant 0 : index
    %c1 = arith.constant 1 : index
    %c0_46 = arith.constant 0 : index
    %90 = vector.load %arg4[%c0_44, %c0_45, %c1, %c0_46] : memref<1x8x16x16xf32, #tpu.memory_space<vmem>>, vector<1x8x1x16xf32>
    %91 = vector.shape_cast %90 : vector<1x8x1x16xf32> to vector<8x16xf32>
    %92 = vector.shape_cast %89 : vector<8x16xf32> to vector<1x8x1x16xf32>
    tpu.vector_store %arg4[%c0_44, %c0_45, %c1, %c0_46], %92 {strides = array<i32>} : memref<1x8x16x16xf32, #tpu.memory_space<vmem>>, vector<1x8x1x16xf32>,
    %93 = vector.extract_strided_slice %84 {offsets = [0, 36], sizes = [8, 16], strides = [1, 1]} : vector<8x286xf32> to vector<8x16xf32>
    %c0_47 = arith.constant 0 : index
    %c0_48 = arith.constant 0 : index
    %c2 = arith.constant 2 : index
    %c0_49 = arith.constant 0 : index
    %94 = vector.load %arg4[%c0_47, %c0_48, %c2, %c0_49] : memref<1x8x16x16xf32, #tpu.memory_space<vmem>>, vector<1x8x1x16xf32>
    %95 = vector.shape_cast %94 : vector<1x8x1x16xf32> to vector<8x16xf32>
    %96 = vector.shape_cast %93 : vector<8x16xf32> to vector<1x8x1x16xf32>
    tpu.vector_store %arg4[%c0_47, %c0_48, %c2, %c0_49], %96 {strides = array<i32>} : memref<1x8x16x16xf32, #tpu.memory_space<vmem>>, vector<1x8x1x16xf32>,
    %97 = vector.extract_strided_slice %84 {offsets = [0, 54], sizes = [8, 16], strides = [1, 1]} : vector<8x286xf32> to vector<8x16xf32>
    %c0_50 = arith.constant 0 : index
    %c0_51 = arith.constant 0 : index
    %c3 = arith.constant 3 : index
    %c0_52 = arith.constant 0 : index
    %98 = vector.load %arg4[%c0_50, %c0_51, %c3, %c0_52] : memref<1x8x16x16xf32, #tpu.memory_space<vmem>>, vector<1x8x1x16xf32>
    %99 = vector.shape_cast %98 : vector<1x8x1x16xf32> to vector<8x16xf32>
    %100 = vector.shape_cast %97 : vector<8x16xf32> to vector<1x8x1x16xf32>
    tpu.vector_store %arg4[%c0_50, %c0_51, %c3, %c0_52], %100 {strides = array<i32>} : memref<1x8x16x16xf32, #tpu.memory_space<vmem>>, vector<1x8x1x16xf32>,
    %101 = vector.extract_strided_slice %84 {offsets = [0, 72], sizes = [8, 16], strides = [1, 1]} : vector<8x286xf32> to vector<8x16xf32>
    %c0_53 = arith.constant 0 : index
    %c0_54 = arith.constant 0 : index
    %c4_55 = arith.constant 4 : index
    %c0_56 = arith.constant 0 : index
    %102 = vector.load %arg4[%c0_53, %c0_54, %c4_55, %c0_56] : memref<1x8x16x16xf32, #tpu.memory_space<vmem>>, vector<1x8x1x16xf32>
    %103 = vector.shape_cast %102 : vector<1x8x1x16xf32> to vector<8x16xf32>
    %104 = vector.shape_cast %101 : vector<8x16xf32> to vector<1x8x1x16xf32>
    tpu.vector_store %arg4[%c0_53, %c0_54, %c4_55, %c0_56], %104 {strides = array<i32>} : memref<1x8x16x16xf32, #tpu.memory_space<vmem>>, vector<1x8x1x16xf32>,
    %105 = vector.extract_strided_slice %84 {offsets = [0, 90], sizes = [8, 16], strides = [1, 1]} : vector<8x286xf32> to vector<8x16xf32>
    %c0_57 = arith.constant 0 : index
    %c0_58 = arith.constant 0 : index
    %c5 = arith.constant 5 : index
    %c0_59 = arith.constant 0 : index
    %106 = vector.load %arg4[%c0_57, %c0_58, %c5, %c0_59] : memref<1x8x16x16xf32, #tpu.memory_space<vmem>>, vector<1x8x1x16xf32>
    %107 = vector.shape_cast %106 : vector<1x8x1x16xf32> to vector<8x16xf32>
    %108 = vector.shape_cast %105 : vector<8x16xf32> to vector<1x8x1x16xf32>
    tpu.vector_store %arg4[%c0_57, %c0_58, %c5, %c0_59], %108 {strides = array<i32>} : memref<1x8x16x16xf32, #tpu.memory_space<vmem>>, vector<1x8x1x16xf32>,
    %109 = vector.extract_strided_slice %84 {offsets = [0, 108], sizes = [8, 16], strides = [1, 1]} : vector<8x286xf32> to vector<8x16xf32>
    %c0_60 = arith.constant 0 : index
    %c0_61 = arith.constant 0 : index
    %c6 = arith.constant 6 : index
    %c0_62 = arith.constant 0 : index
    %110 = vector.load %arg4[%c0_60, %c0_61, %c6, %c0_62] : memref<1x8x16x16xf32, #tpu.memory_space<vmem>>, vector<1x8x1x16xf32>
    %111 = vector.shape_cast %110 : vector<1x8x1x16xf32> to vector<8x16xf32>
    %112 = vector.shape_cast %109 : vector<8x16xf32> to vector<1x8x1x16xf32>
    tpu.vector_store %arg4[%c0_60, %c0_61, %c6, %c0_62], %112 {strides = array<i32>} : memref<1x8x16x16xf32, #tpu.memory_space<vmem>>, vector<1x8x1x16xf32>,
    %113 = vector.extract_strided_slice %84 {offsets = [0, 126], sizes = [8, 16], strides = [1, 1]} : vector<8x286xf32> to vector<8x16xf32>
    %c0_63 = arith.constant 0 : index
    %c0_64 = arith.constant 0 : index
    %c7 = arith.constant 7 : index
    %c0_65 = arith.constant 0 : index
    %114 = vector.load %arg4[%c0_63, %c0_64, %c7, %c0_65] : memref<1x8x16x16xf32, #tpu.memory_space<vmem>>, vector<1x8x1x16xf32>
    %115 = vector.shape_cast %114 : vector<1x8x1x16xf32> to vector<8x16xf32>
    %116 = vector.shape_cast %113 : vector<8x16xf32> to vector<1x8x1x16xf32>
    tpu.vector_store %arg4[%c0_63, %c0_64, %c7, %c0_65], %116 {strides = array<i32>} : memref<1x8x16x16xf32, #tpu.memory_space<vmem>>, vector<1x8x1x16xf32>,
    %117 = vector.extract_strided_slice %84 {offsets = [0, 144], sizes = [8, 16], strides = [1, 1]} : vector<8x286xf32> to vector<8x16xf32>
    %c0_66 = arith.constant 0 : index
    %c0_67 = arith.constant 0 : index
    %c8_68 = arith.constant 8 : index
    %c0_69 = arith.constant 0 : index
    %118 = vector.load %arg4[%c0_66, %c0_67, %c8_68, %c0_69] : memref<1x8x16x16xf32, #tpu.memory_space<vmem>>, vector<1x8x1x16xf32>
    %119 = vector.shape_cast %118 : vector<1x8x1x16xf32> to vector<8x16xf32>
    %120 = vector.shape_cast %117 : vector<8x16xf32> to vector<1x8x1x16xf32>
    tpu.vector_store %arg4[%c0_66, %c0_67, %c8_68, %c0_69], %120 {strides = array<i32>} : memref<1x8x16x16xf32, #tpu.memory_space<vmem>>, vector<1x8x1x16xf32>,
    %121 = vector.extract_strided_slice %84 {offsets = [0, 162], sizes = [8, 16], strides = [1, 1]} : vector<8x286xf32> to vector<8x16xf32>
    %c0_70 = arith.constant 0 : index
    %c0_71 = arith.constant 0 : index
    %c9 = arith.constant 9 : index
    %c0_72 = arith.constant 0 : index
    %122 = vector.load %arg4[%c0_70, %c0_71, %c9, %c0_72] : memref<1x8x16x16xf32, #tpu.memory_space<vmem>>, vector<1x8x1x16xf32>
    %123 = vector.shape_cast %122 : vector<1x8x1x16xf32> to vector<8x16xf32>
    %124 = vector.shape_cast %121 : vector<8x16xf32> to vector<1x8x1x16xf32>
    tpu.vector_store %arg4[%c0_70, %c0_71, %c9, %c0_72], %124 {strides = array<i32>} : memref<1x8x16x16xf32, #tpu.memory_space<vmem>>, vector<1x8x1x16xf32>,
    %125 = vector.extract_strided_slice %84 {offsets = [0, 180], sizes = [8, 16], strides = [1, 1]} : vector<8x286xf32> to vector<8x16xf32>
    %c0_73 = arith.constant 0 : index
    %c0_74 = arith.constant 0 : index
    %c10 = arith.constant 10 : index
    %c0_75 = arith.constant 0 : index
    %126 = vector.load %arg4[%c0_73, %c0_74, %c10, %c0_75] : memref<1x8x16x16xf32, #tpu.memory_space<vmem>>, vector<1x8x1x16xf32>
    %127 = vector.shape_cast %126 : vector<1x8x1x16xf32> to vector<8x16xf32>
    %128 = vector.shape_cast %125 : vector<8x16xf32> to vector<1x8x1x16xf32>
    tpu.vector_store %arg4[%c0_73, %c0_74, %c10, %c0_75], %128 {strides = array<i32>} : memref<1x8x16x16xf32, #tpu.memory_space<vmem>>, vector<1x8x1x16xf32>,
    %129 = vector.extract_strided_slice %84 {offsets = [0, 198], sizes = [8, 16], strides = [1, 1]} : vector<8x286xf32> to vector<8x16xf32>
    %c0_76 = arith.constant 0 : index
    %c0_77 = arith.constant 0 : index
    %c11 = arith.constant 11 : index
    %c0_78 = arith.constant 0 : index
    %130 = vector.load %arg4[%c0_76, %c0_77, %c11, %c0_78] : memref<1x8x16x16xf32, #tpu.memory_space<vmem>>, vector<1x8x1x16xf32>
    %131 = vector.shape_cast %130 : vector<1x8x1x16xf32> to vector<8x16xf32>
    %132 = vector.shape_cast %129 : vector<8x16xf32> to vector<1x8x1x16xf32>
    tpu.vector_store %arg4[%c0_76, %c0_77, %c11, %c0_78], %132 {strides = array<i32>} : memref<1x8x16x16xf32, #tpu.memory_space<vmem>>, vector<1x8x1x16xf32>,
    %133 = vector.extract_strided_slice %84 {offsets = [0, 216], sizes = [8, 16], strides = [1, 1]} : vector<8x286xf32> to vector<8x16xf32>
    %c0_79 = arith.constant 0 : index
    %c0_80 = arith.constant 0 : index
    %c12_81 = arith.constant 12 : index
    %c0_82 = arith.constant 0 : index
    %134 = vector.load %arg4[%c0_79, %c0_80, %c12_81, %c0_82] : memref<1x8x16x16xf32, #tpu.memory_space<vmem>>, vector<1x8x1x16xf32>
    %135 = vector.shape_cast %134 : vector<1x8x1x16xf32> to vector<8x16xf32>
    %136 = vector.shape_cast %133 : vector<8x16xf32> to vector<1x8x1x16xf32>
    tpu.vector_store %arg4[%c0_79, %c0_80, %c12_81, %c0_82], %136 {strides = array<i32>} : memref<1x8x16x16xf32, #tpu.memory_space<vmem>>, vector<1x8x1x16xf32>,
    %137 = vector.extract_strided_slice %84 {offsets = [0, 234], sizes = [8, 16], strides = [1, 1]} : vector<8x286xf32> to vector<8x16xf32>
    %c0_83 = arith.constant 0 : index
    %c0_84 = arith.constant 0 : index
    %c13 = arith.constant 13 : index
    %c0_85 = arith.constant 0 : index
    %138 = vector.load %arg4[%c0_83, %c0_84, %c13, %c0_85] : memref<1x8x16x16xf32, #tpu.memory_space<vmem>>, vector<1x8x1x16xf32>
    %139 = vector.shape_cast %138 : vector<1x8x1x16xf32> to vector<8x16xf32>
    %140 = vector.shape_cast %137 : vector<8x16xf32> to vector<1x8x1x16xf32>
    tpu.vector_store %arg4[%c0_83, %c0_84, %c13, %c0_85], %140 {strides = array<i32>} : memref<1x8x16x16xf32, #tpu.memory_space<vmem>>, vector<1x8x1x16xf32>,
    %141 = vector.extract_strided_slice %84 {offsets = [0, 252], sizes = [8, 16], strides = [1, 1]} : vector<8x286xf32> to vector<8x16xf32>
    %c0_86 = arith.constant 0 : index
    %c0_87 = arith.constant 0 : index
    %c14 = arith.constant 14 : index
    %c0_88 = arith.constant 0 : index
    %142 = vector.load %arg4[%c0_86, %c0_87, %c14, %c0_88] : memref<1x8x16x16xf32, #tpu.memory_space<vmem>>, vector<1x8x1x16xf32>
    %143 = vector.shape_cast %142 : vector<1x8x1x16xf32> to vector<8x16xf32>
    %144 = vector.shape_cast %141 : vector<8x16xf32> to vector<1x8x1x16xf32>
    tpu.vector_store %arg4[%c0_86, %c0_87, %c14, %c0_88], %144 {strides = array<i32>} : memref<1x8x16x16xf32, #tpu.memory_space<vmem>>, vector<1x8x1x16xf32>,
    %145 = vector.extract_strided_slice %84 {offsets = [0, 270], sizes = [8, 16], strides = [1, 1]} : vector<8x286xf32> to vector<8x16xf32>
    %c0_89 = arith.constant 0 : index
    %c0_90 = arith.constant 0 : index
    %c15 = arith.constant 15 : index
    %c0_91 = arith.constant 0 : index
    %146 = vector.load %arg4[%c0_89, %c0_90, %c15, %c0_91] : memref<1x8x16x16xf32, #tpu.memory_space<vmem>>, vector<1x8x1x16xf32>
    %147 = vector.shape_cast %146 : vector<1x8x1x16xf32> to vector<8x16xf32>
    %148 = vector.shape_cast %145 : vector<8x16xf32> to vector<1x8x1x16xf32>
    tpu.vector_store %arg4[%c0_89, %c0_90, %c15, %c0_91], %148 {strides = array<i32>} : memref<1x8x16x16xf32, #tpu.memory_space<vmem>>, vector<1x8x1x16xf32>,
    return
  }
  func.func @transform_0(%arg0: i32) -> (i32, i32, i32, i32) {
    %c0_i32 = arith.constant 0 : i32
    %c0_i32_0 = arith.constant 0 : i32
    %c0_i32_1 = arith.constant 0 : i32
    %c0_i32_2 = arith.constant 0 : i32
    return %arg0, %c0_i32, %c0_i32_0, %c0_i32_1 : i32, i32, i32, i32
  }
  func.func @transform_1(%arg0: i32) -> (i32, i32) {
    %c0_i32 = arith.constant 0 : i32
    %c0_i32_0 = arith.constant 0 : i32
    %c0_i32_1 = arith.constant 0 : i32
    return %c0_i32, %c0_i32_0 : i32, i32
  }
  func.func @transform_2(%arg0: i32) -> (i32, i32) {
    %c0_i32 = arith.constant 0 : i32
    %c0_i32_0 = arith.constant 0 : i32
    %c0_i32_1 = arith.constant 0 : i32
    return %c0_i32, %c0_i32_0 : i32, i32
  }
  func.func @transform_3(%arg0: i32) -> (i32, i32, i32, i32) {
    %c0_i32 = arith.constant 0 : i32
    %c0_i32_0 = arith.constant 0 : i32
    %c0_i32_1 = arith.constant 0 : i32
    %c0_i32_2 = arith.constant 0 : i32
    return %arg0, %c0_i32, %c0_i32_0, %c0_i32_1 : i32, i32, i32, i32
  }
}

</mosaic_0001>

<bundles_post_ra>
// kernel: tpu_custom_call.1
= control target key start
LH: loop header
LB: loop body
LE: loop exit
PB: predicated region body
PF: predicated region fallthrough
CT: control target
= control target key end

     0   :  { %8 = vsyncpa [#allocation5], 0  ;;  %s3536_s0 = inlined_call_operand.hbm [shape: f32[2,4,16,16], index: 0, kind: input, shape index: {}]   ;;  %s3537_s1 = inlined_call_operand.vmem [shape: bf16[8,36], index: 1, kind: input, shape index: {}]   ;;  %s3538_s2 = inlined_call_operand.vmem [shape: f32[8,1], index: 2, kind: input, shape index: {}]   ;;  %s3539_s3 = inlined_call_operand.hbm [shape: f32[2,8,16,16], index: 3, kind: output, shape index: {}]  }
   0x1   :  { %10 = vsyncpa [#allocation5 + $0x1], 0 }
   0x2   :  { %11 = vsyncpa [#allocation6], 0 }
   0x3   :  { %13 = vsyncpa [#allocation6 + $0x1], 0  ;;  %s2220_s12 = smov 0   ;;  %s2222_s13 = smov 0  }
   0x4   :  { %s2224_s14 = smov 0   ;;  %s2226_s15 = smov 0  }
   0x5 LB: > { %s2241_s16 = sadd.s32 4294967295, %s2151_s15   ;;  %s1926_s17 = sadd.s32 4294967294, %s2151_s15   ;;  %s2151_s15 = sphi %s2226_s15, %s3558_s15   ;;  %s2147_s14 = sphi %s2224_s14, %s3557_s14   ;;  %s2143_s13 = sphi %s2222_s13, %s3556_s13   ;;  %s2139_s12 = sphi %s2220_s12, %s3555_s12  }
   0x6   : > { %s2245_s18 = sadd.s32 1, %s2151_s15   ;;  %s26_s19 = sadd.s32 1, %s2147_s14 }
   0x7   : > { %s23_s20 = ssub.s32 %s2151_s15, %s2245_s18  ;;  %p33_p0 = scmp.ne.s32.totalorder %s2147_s14, %s2143_s13 }
   0x8   : > { %p24_p1 = scmp.eq.s32.totalorder %s23_s20, 0  ;;  %p34_p2 = scmp.eq.s32.totalorder %s2151_s15, 0 }
   0x9   : > { %p39_p3 = scmp.ne.s32.totalorder %s2143_s13, %s2139_s12  ;;  %p40_p4 = scmp.eq.s32.totalorder %s2241_s16, 0 }
   0xa   : > { %s2257_s21 = scalar_select %p24_p1, %s2147_s14, %s26_s19  }
   0xb   : > { %p2259_p5 = por %p34_p2, %p33_p0  ;;  %p2263_p6 = por %p40_p4, %p39_p3 }
   0xc   : > { %p105_p7 = scmp.eq.s32.totalorder %s2241_s16, 1  ;;  %p111_p8 = scmp.eq.s32.totalorder %s1926_s17, 1 }
   0xd   : > { %p1971_p10 = scmp.lt.s32.totalorder %s2151_s15, 2  ;;  %s137_s26 = sand.u32 1, %s2147_s14  }
   0xe   : > { %p2270_p11 = por %p105_p7, %p33_p0  ;;  %p2274_p12 = por %p111_p8, %p39_p3 }
   0xf   : > { %s1943_s27 = sshll.u32 %s2151_s15, 10  ;;  %s1929_s28 = sshll.u32 %s137_s26, 6 }
  0x10   : > { %s3543_s24 = scalar_select %p2270_p11, 1, 0 }
  0x11   : > { %s3544_s25 = scalar_select %p2274_p12, 1, 0 }
  0x12   : > { %s2283_s4 = scalar_lea.hbm %s3536_s0, %s1943_s27  ;;  %s141_s5 = scalar_lea.vmem [#allocation4], %s1929_s28 }
  0x13   : > { %s148_s6 = sshll.u32 %s141_s5, 4  ;;  %p2287_p13 = pnand %p1971_p10, %p2259_p5  ;;  %s2291_s6 = int_to_ptr.vmem [resolvable:$true] %s148_s6 }
  0x14   : > { %s2293_s8 = scalar_lea.sflag [#allocation5], %s137_s26  ;;  %s2055_s9 = scalar_lea.hbm %s2283_s4, 1024 }
  0x15   : > { %p2056_p0 = scmp.ne.s32.totalorder %s2283_s4, %s2055_s9  ;;  %p2057_p1 = pneg %p2287_p13 }
  0x16   : > { %s2060_s17 = scalar_lea.hbm %s3536_s0, 2048  ;;  %p2061_p4 = scmp.lt.u32.totalorder %s2283_s4, %s3536_s0 }
  0x17   : > { %p2058_p2 = pnand %p2057_p1, %p2056_p0  ;;  %p2062_p5 = scmp.lt.u32.totalorder %s2060_s17, %s2055_s9 }
  0x18   : > { %p2064_p8 = scmp.lt.u32.totalorder %s2055_s9, %s2283_s4 }
  0x19   : > { %p2059_p3 = pneg %p2058_p2  ;;  %p2063_p7 = por %p2062_p5, %p2061_p4 }
  0x1b   : > { %p2065_p10 = por %p2064_p8, %p2063_p7 }
  0x1d   : > { %p2066_p9 = pnand %p2065_p10, %p2059_p3 }
  0x1f   : > { %2069 = shalt.err (!%p2066_p9)
}
  0x20   : > { %s2070_s22 = scalar_lea.vmem %s2291_s6, 1024  ;;  %s2153_s26 = smov [#allocation4]  }
  0x21   : > { %p2071_p0 = scmp.ne.s32.totalorder %s2291_s6, %s2070_s22  ;;  %s2075_s27 = sshll.u32 %s2153_s26, 4  ;;  %s2076_s27 = int_to_ptr.vmem [resolvable:$false] %s2075_s27 }
  0x22   : > { %s2077_s28 = scalar_lea.vmem %s2076_s27, 2048  ;;  %p2078_p11 = scmp.lt.s32.totalorder %s2291_s6, %s2076_s27 }
  0x23   : > { %p2073_p2 = pnand %p2071_p0, %p2057_p1  ;;  %p2079_p4 = scmp.lt.s32.totalorder %s2077_s28, %s2070_s22 }
  0x25   : > { %p2074_p12 = pneg %p2073_p2  ;;  %p2080_p5 = por %p2079_p4, %p2078_p11 }
  0x27   : > { %p2081_p7 = pnand %p2080_p5, %p2074_p12 }
  0x29   : > { %2084 = shalt.err (!%p2081_p7)
}
  0x2a   : > { %s2154_s29 = smov 128   ;;  %s2155_s30 = smov 8  }
  0x2b   : > { %1966 = dma.hbm_to_vmem [thread:$0]  (!%p2287_p13), %s2283_s4, 1024, %s2291_s6, %s2293_s8, %s2154_s29, %s2154_s29, %s2155_s30  }
  0x2c   : > { %p1932_p9 = scmp.ge.s32.totalorder %s2151_s15, 1  ;;  %p156_p1 = scmp.lt.s32.totalorder %s2151_s15, 3 }
  0x2e   : > { %p157_p3 = pnand %p1932_p9, %p156_p1 }
  0x2f   : > { %s2324_s5 = sand.u32 (!%p157_p3), 1, %s2143_s13  }
  0x30   : > { %160 = sbr.rel (%p157_p3) target bundleno = 1158 (0x486), region = 32  ;;  %s1933_s9 = sshll.u32 (!%p157_p3), %s2324_s5, 6 }
  0x31   : > { %s163_s10 = scalar_lea.sflag (!%p157_p3), [#allocation5], %s2324_s5  ;;  %s2328_s11 = scalar_lea.vmem (!%p157_p3), [#allocation4], %s1933_s9 }
  0x37   : > { %2130 = dma.done.wait (%p2263_p6), %s163_s10, 1024  }
  0x38   : > { %2132 = vsyncadd (%p2263_p6), %s163_s10, 4294966272  ;;  %v192_v0 = vld [vmem:[%s2328_s11 + $0x10] sm:$0xff]  ;;  %v190_v1 = vld [vmem:[%s2328_s11] sm:$0xff]  ;;  %s2156_s4 = smov 127   ;;  %s2157_s6 = smov 1   ;;  %vm278_vm0 = vcmask 7168  }
  0x39   : > { %210 = vrot.lane.b32.xlu0 %v192_v0, %s2156_s4  ;;  %206 = vrot.lane.b32.xlu1 %v190_v1, %s2156_s4  ;;  %v194_v2 = vld [vmem:[%s2328_s11 + $0x20] sm:$0xff]  ;;  %s2158_s7 = smov 3   ;;  %v196_v3 = vld [vmem:[%s2328_s11 + $0x30] sm:$0xff]  ;;  %vm287_vm1 = vcmask 138240   ;;  %vm301_vm2 = vcmask 1041409   ;;  %vm303_vm3 = vcmask 1045509  }
  0x3a   : > { %v191_v4 = vld [vmem:[%s2328_s11 + $0x8] sm:$0xff]  ;;  %v193_v5 = vld [vmem:[%s2328_s11 + $0x18] sm:$0xff]  ;;  %vm306_vm4 = vcmask 1042434   ;;  %vm308_vm5 = vcmask 1046534   ;;  %vm311_vm6 = vcmask 1043459   ;;  %vm316_vm7 = vcmask 142336  }
  0x3b   : > { %v195_v6 = vld [vmem:[%s2328_s11 + $0x28] sm:$0xff]  ;;  %v197_v7 = vld [vmem:[%s2328_s11 + $0x38] sm:$0xff]  ;;  %vm313_vm8 = vcmask 1047559   ;;  %s2159_s23 = smov 18   ;;  %s2160_s8 = smov 36   ;;  %vm330_vm9 = vcmask 289936  }
  0x3c   : > { %s2161_s17 = smov 54   ;;  %s2162_s19 = smov 72   ;;  %vm335_vm10 = vcmask 437536   ;;  %vm349_vm11 = vcmask 585136   ;;  %vm363_vm12 = vcmask 732736   ;;  %vm381_vm13 = vcmask 880336  }
  0x3d   : > { %234 = vrot.lane.b32.xlu0 %v192_v0, %s2157_s6  ;;  %230 = vrot.lane.b32.xlu1 %v190_v1, %s2157_s6  ;;  %s2163_s20 = smov 52   ;;  %s2164_s22 = smov 34   ;;  %vm412_vm14 = vcmask 1044464   ;;  %vm413_vm15 = vcmask 130052  }
  0x3e   : > { %s2165_s26 = smov 90   ;;  %s2166_s27 = smov 70  }
  0x3f   : > { %s2167_s28 = smov 16   ;;  %s2168_s29 = smov 126  }
  0x40   : > { %s2169_s30 = smov 124   ;;  %s2170_s9 = smov 108  }
  0x41   : > { %258 = vrot.lane.b32.xlu0 %v192_v0, %s2158_s7  ;;  %214 = vrot.lane.b32.xlu1 %v194_v2, %s2156_s4  ;;  %s2171_s10 = smov 106   ;;  %s2172_s11 = smov 88  }
  0x42   : > { %p3552_p11 = scmp.ne.s32.totalorder %s3543_s24, 0 }
  0x45   : > { %238 = vrot.lane.b32.xlu0 %v194_v2, %s2157_s6  ;;  %254 = vrot.lane.b32.xlu1 %v190_v1, %s2158_s7 }
  0x49   : > { %262 = vrot.lane.b32.xlu0 %v194_v2, %s2158_s7  ;;  %218 = vrot.lane.b32.xlu1 %v196_v3, %s2156_s4 }
  0x4d   : > { %242 = vrot.lane.b32.xlu0 %v196_v3, %s2157_s6  ;;  %266 = vrot.lane.b32.xlu1 %v196_v3, %s2158_s7 }
  0x51   : > { %208 = vrot.lane.b32.xlu0 %v191_v4, %s2156_s4  ;;  %212 = vrot.lane.b32.xlu1 %v193_v5, %s2156_s4 }
  0x55   : > { %232 = vrot.lane.b32.xlu0 %v191_v4, %s2157_s6  ;;  %236 = vrot.lane.b32.xlu1 %v193_v5, %s2157_s6 }
  0x59   : > { %256 = vrot.lane.b32.xlu0 %v191_v4, %s2158_s7  ;;  %260 = vrot.lane.b32.xlu1 %v193_v5, %s2158_s7 }
  0x5d   : > { %216 = vrot.lane.b32.xlu0 %v195_v6, %s2156_s4  ;;  %240 = vrot.lane.b32.xlu1 %v195_v6, %s2157_s6 }
  0x61   : > { %264 = vrot.lane.b32.xlu0 %v195_v6, %s2158_s7  ;;  %220 = vrot.lane.b32.xlu1 %v197_v7, %s2156_s4 }
  0x65   : > { %244 = vrot.lane.b32.xlu0 %v197_v7, %s2157_s6  ;;  %268 = vrot.lane.b32.xlu1 %v197_v7, %s2158_s7  ;;  %s2173_s6 = smov 32   ;;  %s2174_s7 = smov 14  }
  0xab   : > { %v211_v8 = vpop.permute.xlu0 %210  ;;  %v207_v9 = vpop.permute.xlu1 %206 }
  0xaf   : > { %v235_v10 = vpop.permute.xlu0 %234  ;;  %v231_v11 = vpop.permute.xlu1 %230 }
  0xb0   : > { %v281_v14 = vsel %vm278_vm0, %v211_v8, %v235_v10  ;;  %v279_v15 = vsel %vm278_vm0, %v207_v9, %v231_v11 }
  0xb3   : > { %v259_v12 = vpop.permute.xlu0 %258  ;;  %v215_v13 = vpop.permute.xlu1 %214 }
  0xb4   : > { %v290_v16 = vsel %vm287_vm1, %v281_v14, %v259_v12 }
  0xb5   : > { %v318_v23 = vrot.slane %v290_v16, 7  ;;  %v338_v24 = vrot.slane %v290_v16, 1  ;;  %v352_v25 = vrot.slane %v290_v16, 2  ;;  %v2380_v63 = vcombine.high %v290_v16, %v290_v16 }
  0xb7   : > { %v239_v17 = vpop.permute.xlu0 %238  ;;  %v255_v18 = vpop.permute.xlu1 %254  ;;  %v417_v8 = vrot.slane %v2380_v63, 2  ;;  %v369_v12 = vrot.slane %v2380_v63, 7 }
  0xb8   : > { %v288_v19 = vsel %vm287_vm1, %v279_v15, %v255_v18  ;;  %v283_v26 = vsel %vm278_vm0, %v215_v13, %v239_v17 }
  0xb9   : > { %v300_v20 = vrot.slane %v288_v19, 1  ;;  %v337_v21 = vrot.slane %v288_v19, 2  ;;  %v351_v22 = vrot.slane %v288_v19, 3  ;;  %v319_v30 = vsel %vm301_vm2, %v318_v23, %v288_v19 }
  0xba   : > { %v320_v37 = vsel %vm303_vm3, %v318_v23, %v319_v30  ;;  %v2373_v57 = vcombine.high %v288_v19, %v288_v19 }
  0xbb   : > { %v263_v27 = vpop.permute.xlu0 %262  ;;  %v219_v28 = vpop.permute.xlu1 %218  ;;  %v302_v29 = vsel %vm301_vm2, %v290_v16, %v300_v20  ;;  %v339_v31 = vsel %vm301_vm2, %v338_v24, %v337_v21  ;;  %v353_v33 = vsel %vm301_vm2, %v352_v25, %v351_v22  ;;  %v398_v22 = vrot.slane %v2380_v63, 1 }
  0xbc   : > { %v292_v32 = vsel %vm287_vm1, %v283_v26, %v263_v27  ;;  %v304_v40 = vsel %vm303_vm3, %v290_v16, %v302_v29  ;;  %v340_v41 = vsel %vm303_vm3, %v338_v24, %v339_v31  ;;  %v354_v45 = vsel %vm303_vm3, %v352_v25, %v353_v33 }
  0xbd   : > { %v321_v34 = vrot.slane %v292_v32, 6  ;;  %v305_v35 = vrot.slane %v292_v32, 7  ;;  %v355_v36 = vrot.slane %v292_v32, 1  ;;  %v341_v50 = vsel %vm306_vm4, %v292_v32, %v340_v41 }
  0xbe   : > { %v342_v62 = vsel %vm308_vm5, %v292_v32, %v341_v50  ;;  %v416_v4 = vrot.slane %v2373_v57, 3  ;;  %v2385_v5 = vcombine.high %v292_v32, %v292_v32  ;;  %v397_v9 = vrot.slane %v2373_v57, 2 }
  0xbf   : > { %v243_v38 = vpop.permute.xlu0 %242  ;;  %v267_v39 = vpop.permute.xlu1 %266  ;;  %v322_v43 = vsel %vm306_vm4, %v321_v34, %v320_v37  ;;  %v307_v44 = vsel %vm306_vm4, %v305_v35, %v304_v40  ;;  %v356_v47 = vsel %vm306_vm4, %v355_v36, %v354_v45  ;;  %v370_v20 = vsel %vm301_vm2, %v369_v12, %v2373_v57 }
  0xc0   : > { %v285_v42 = vsel %vm278_vm0, %v219_v28, %v243_v38  ;;  %v323_v54 = vsel %vm308_vm5, %v321_v34, %v322_v43  ;;  %v309_v55 = vsel %vm308_vm5, %v305_v35, %v307_v44  ;;  %v357_v56 = vsel %vm308_vm5, %v355_v36, %v356_v47 }
  0xc1   : > { %v294_v46 = vsel %vm287_vm1, %v285_v42, %v267_v39  ;;  %v418_v15 = vsel %vm301_vm2, %v417_v8, %v416_v4  ;;  %v420_v16 = vrot.slane %v2385_v5, 1  ;;  %v372_v21 = vrot.slane %v2385_v5, 6 }
  0xc2   : > { %v324_v48 = vrot.slane %v294_v46, 5  ;;  %v310_v49 = vrot.slane %v294_v46, 6  ;;  %v343_v51 = vrot.slane %v294_v46, 7  ;;  %v358_v1 = vsel %vm311_vm6, %v294_v46, %v357_v56 }
  0xc3   : > { %v209_v52 = vpop.permute.xlu0 %208  ;;  %v213_v53 = vpop.permute.xlu1 %212  ;;  %v359_v7 = vsel %vm313_vm8, %v294_v46, %v358_v1  ;;  %v2402_v19 = vcombine.high %v294_v46, %v294_v46  ;;  %v383_v23 = vrot.slane %v2373_v57, 1  ;;  %v419_v26 = vsel %vm303_vm3, %v417_v8, %v418_v15 }
  0xc4   : > { %v325_v58 = vsel %vm311_vm6, %v324_v48, %v323_v54  ;;  %v312_v59 = vsel %vm311_vm6, %v310_v49, %v309_v55  ;;  %v344_v0 = vsel %vm311_vm6, %v343_v51, %v342_v62  ;;  %v421_v29 = vsel %vm306_vm4, %v420_v16, %v419_v26 }
  0xc5   : > { %v326_v60 = vsel %vm313_vm8, %v324_v48, %v325_v58  ;;  %v314_v61 = vsel %vm313_vm8, %v310_v49, %v312_v59  ;;  %v345_v6 = vsel %vm313_vm8, %v343_v51, %v344_v0  ;;  %v399_v30 = vsel %vm301_vm2, %v398_v22, %v397_v9 }
  0xc6   : > { %327 = vrot.lane.b32.xlu0 %v326_v60, %s2159_s23  ;;  %332 = vrot.lane.b32.xlu1 %v314_v61, %s2160_s8  ;;  %317 = vst.msk [vmem:[#allocation2] sm:$0xf] %vm316_vm7, %v314_v61  ;;  %v371_v31 = vsel %vm303_vm3, %v369_v12, %v370_v20  ;;  %v375_v35 = vrot.slane %v2402_v19, 5  ;;  %v422_v39 = vsel %vm308_vm5, %v420_v16, %v421_v29  ;;  %s2175_s23 = smov 50   ;;  %vm523_vm7 = vcmask 1044448   ;;  %s2176_s8 = smov 110  }
  0xc7   : > { %v233_v2 = vpop.permute.xlu0 %232  ;;  %v237_v3 = vpop.permute.xlu1 %236  ;;  %v373_v34 = vsel %vm306_vm4, %v372_v21, %v371_v31  ;;  %v400_v40 = vsel %vm303_vm3, %v398_v22, %v399_v30  ;;  %v384_v44 = vsel %vm301_vm2, %v2380_v63, %v383_v23  ;;  %v423_v51 = vsel %vm311_vm6, %v2402_v19, %v422_v39 }
  0xc8   : > { %v280_v13 = vsel %vm278_vm0, %v209_v52, %v233_v2  ;;  %v282_v14 = vsel %vm278_vm0, %v213_v53, %v237_v3  ;;  %v374_v48 = vsel %vm308_vm5, %v372_v21, %v373_v34  ;;  %v403_v52 = vrot.slane %v2402_v19, 7 }
  0xc9   : > { %v376_v49 = vsel %vm311_vm6, %v375_v35, %v374_v48  ;;  %v401_v57 = vsel %vm306_vm4, %v2385_v5, %v400_v40  ;;  %v385_v58 = vsel %vm303_vm3, %v2380_v63, %v384_v44  ;;  %v424_v40 = vsel %vm313_vm8, %v2402_v19, %v423_v51 }
  0xca   : > { %346 = vrot.lane.b32.xlu0 %v345_v6, %s2161_s17  ;;  %360 = vrot.lane.b32.xlu1 %v359_v7, %s2162_s19  ;;  %s2177_s17 = smov 91   ;;  %s2178_s19 = smov 109  }
  0xcb   : > { %v257_v10 = vpop.permute.xlu0 %256  ;;  %v261_v11 = vpop.permute.xlu1 %260 }
  0xcc   : > { %v2397_v17 = vsel %vm287_vm1, %v280_v13, %v257_v10  ;;  %v2400_v18 = vsel %vm287_vm1, %v282_v14, %v261_v11  ;;  %v402_v10 = vsel %vm308_vm5, %v2385_v5, %v401_v57  ;;  %v386_v11 = vrot.slane %v2385_v5, 7 }
  0xcd   : > { %v448_v27 = vrot.slane %v2397_v17, 1  ;;  %v434_v28 = vrot.slane %v2400_v18, 7  ;;  %v462_v32 = vrot.slane %v2397_v17, 2  ;;  %v463_v33 = vrot.slane %v2400_v18, 1 }
  0xce   : > { %v2433_v45 = vcombine.high %v2397_v17, %v2397_v17  ;;  %v2452_v59 = vcombine.high %v2400_v18, %v2400_v18  ;;  %v476_v12 = vrot.slane %v2397_v17, 3  ;;  %v477_v13 = vrot.slane %v2400_v18, 2 }
  0xcf   : > { %v217_v24 = vpop.permute.xlu0 %216  ;;  %v241_v25 = vpop.permute.xlu1 %240  ;;  %v449_v41 = vsel %vm301_vm2, %v2400_v18, %v448_v27  ;;  %v435_v43 = vsel %vm301_vm2, %v434_v28, %v2397_v17  ;;  %v464_v50 = vsel %vm301_vm2, %v463_v33, %v462_v32  ;;  %v387_v26 = vsel %vm306_vm4, %v386_v11, %v385_v58 }
  0xd0   : > { %v284_v36 = vsel %vm278_vm0, %v217_v24, %v241_v25  ;;  %v450_v55 = vsel %vm303_vm3, %v2400_v18, %v449_v41  ;;  %v436_v56 = vsel %vm303_vm3, %v434_v28, %v435_v43  ;;  %v508_v0 = vrot.slane %v2433_v45, 1 }
  0xd1   : > { %v465_v63 = vsel %vm303_vm3, %v463_v33, %v464_v50  ;;  %v494_v23 = vrot.slane %v2452_v59, 7  ;;  %v377_v24 = vsel %vm313_vm8, %v375_v35, %v376_v49  ;;  %v404_v25 = vsel %vm311_vm6, %v403_v52, %v402_v10 }
  0xd2   : > { %v509_v22 = vsel %vm301_vm2, %v2452_v59, %v508_v0  ;;  %v389_v27 = vrot.slane %v2402_v19, 6  ;;  %v541_v28 = vrot.slane %v2433_v45, 3  ;;  %v478_v29 = vsel %vm301_vm2, %v477_v13, %v476_v12 }
  0xd3   : > { %v265_v37 = vpop.permute.xlu0 %264  ;;  %v221_v38 = vpop.permute.xlu1 %220  ;;  %v542_v31 = vrot.slane %v2452_v59, 2  ;;  %v527_v32 = vrot.slane %v2433_v45, 2  ;;  %v510_v34 = vsel %vm303_vm3, %v2452_v59, %v509_v22  ;;  %v528_v35 = vrot.slane %v2452_v59, 1 }
  0xd4   : > { %v2425_v42 = vsel %vm287_vm1, %v284_v36, %v265_v37  ;;  %v479_v41 = vsel %vm303_vm3, %v477_v13, %v478_v29 }
  0xd5   : > { %v451_v46 = vrot.slane %v2425_v42, 7  ;;  %v437_v47 = vrot.slane %v2425_v42, 6  ;;  %v2460_v1 = vcombine.high %v2425_v42, %v2425_v42  ;;  %v466_v6 = vsel %vm306_vm4, %v2425_v42, %v465_v63 }
  0xd6   : > { %v467_v21 = vsel %vm308_vm5, %v2425_v42, %v466_v6  ;;  %v480_v30 = vrot.slane %v2425_v42, 1  ;;  %v388_v42 = vsel %vm308_vm5, %v386_v11, %v387_v26  ;;  %v543_v44 = vsel %vm301_vm2, %v542_v31, %v541_v28 }
  0xd7   : > { %v245_v53 = vpop.permute.xlu0 %244  ;;  %v269_v54 = vpop.permute.xlu1 %268  ;;  %v452_v61 = vsel %vm306_vm4, %v451_v46, %v450_v55  ;;  %v438_v62 = vsel %vm306_vm4, %v437_v47, %v436_v56  ;;  %v511_v18 = vrot.slane %v2460_v1, 7  ;;  %v497_v39 = vrot.slane %v2460_v1, 6 }
  0xd8   : > { %v286_v60 = vsel %vm278_vm0, %v221_v38, %v245_v53  ;;  %v453_v8 = vsel %vm308_vm5, %v451_v46, %v452_v61  ;;  %v439_v9 = vsel %vm308_vm5, %v437_v47, %v438_v62  ;;  %v495_v38 = vsel %vm301_vm2, %v494_v23, %v2433_v45 }
  0xd9   : > { %v2463_v2 = vsel %vm287_vm1, %v286_v60, %v269_v54  ;;  %v512_v36 = vsel %vm306_vm4, %v511_v18, %v510_v34  ;;  %v481_v43 = vsel %vm306_vm4, %v480_v30, %v479_v41  ;;  %v545_v46 = vrot.slane %v2460_v1, 1 }
  0xda   : > { %v454_v3 = vrot.slane %v2463_v2, 6  ;;  %v440_v4 = vrot.slane %v2463_v2, 5  ;;  %v468_v7 = vrot.slane %v2463_v2, 7  ;;  %v2488_v5 = vcombine.high %v2463_v2, %v2463_v2 }
  0xdb   : > { %v405_v47 = vsel %vm313_vm8, %v403_v52, %v404_v25  ;;  %v513_v45 = vsel %vm308_vm5, %v511_v18, %v512_v36  ;;  %v390_v48 = vsel %vm311_vm6, %v389_v27, %v388_v42  ;;  %v496_v49 = vsel %vm303_vm3, %v494_v23, %v495_v38 }
  0xdc   : > { %v455_v14 = vsel %vm311_vm6, %v454_v3, %v453_v8  ;;  %v441_v15 = vsel %vm311_vm6, %v440_v4, %v439_v9  ;;  %v469_v17 = vsel %vm311_vm6, %v468_v7, %v467_v21  ;;  %v514_v37 = vrot.slane %v2488_v5, 6 }
  0xdd   : > { %v456_v16 = vsel %vm313_vm8, %v454_v3, %v455_v14  ;;  %v442_v20 = vsel %vm313_vm8, %v440_v4, %v441_v15  ;;  %v470_v33 = vsel %vm313_vm8, %v468_v7, %v469_v17  ;;  %v498_v51 = vsel %vm306_vm4, %v497_v39, %v496_v49 }
  0xde   : > { %457 = vrot.lane.b32.xlu1 %v456_v16, %s2163_s20  ;;  %443 = vrot.lane.b32.xlu0 %v442_v20, %s2164_s22  ;;  %v515_v50 = vsel %vm311_vm6, %v514_v37, %v513_v45  ;;  %v500_v53 = vrot.slane %v2488_v5, 5  ;;  %v529_v19 = vsel %vm301_vm2, %v528_v35, %v527_v32  ;;  %v482_v52 = vsel %vm308_vm5, %v480_v30, %v481_v43  ;;  %vm414_vm2 = vmor %vm413_vm15, %vm412_vm14  ;;  %s2179_s20 = smov 92   ;;  %s2194_s22 = smov 40  }
  0xdf   : > { %v544_v54 = vsel %vm303_vm3, %v542_v31, %v543_v44  ;;  %v516_v56 = vsel %vm313_vm8, %v514_v37, %v515_v50  ;;  %v391_v57 = vsel %vm313_vm8, %v389_v27, %v390_v48  ;;  %v499_v58 = vsel %vm308_vm5, %v497_v39, %v498_v51  ;;  %v717_v37 = vld [vmem:[%s3538_s2] sm:$0xff] }
  0xe0   : > { %v546_v55 = vsel %vm306_vm4, %v545_v46, %v544_v54  ;;  %v530_v59 = vsel %vm303_vm3, %v528_v35, %v529_v19  ;;  %v501_v60 = vsel %vm311_vm6, %v500_v53, %v499_v58  ;;  %v483_v61 = vsel %vm311_vm6, %v2463_v2, %v482_v52 }
  0xe1   : > { %v531_v62 = vsel %vm306_vm4, %v2460_v1, %v530_v59  ;;  %v533_v0 = vrot.slane %v2488_v5, 7  ;;  %v547_v63 = vsel %vm308_vm5, %v545_v46, %v546_v55  ;;  %v502_v3 = vsel %vm313_vm8, %v500_v53, %v501_v60 }
  0xe2   : > { %378 = vrot.lane.b32.xlu1 %v377_v24, %s2165_s26  ;;  %471 = vrot.lane.b32.xlu0 %v470_v33, %s2166_s27  ;;  %v484_v4 = vsel %vm313_vm8, %v2463_v2, %v483_v61  ;;  %v532_v6 = vsel %vm308_vm5, %v2460_v1, %v531_v62  ;;  %v548_v7 = vsel %vm311_vm6, %v2488_v5, %v547_v63  ;;  %vm409_vm0 = vcmask 1031168   ;;  %s2196_s27 = smov 4  }
  0xe3   : > { %v534_v8 = vsel %vm311_vm6, %v533_v0, %v532_v6  ;;  %v549_v9 = vsel %vm313_vm8, %v2488_v5, %v548_v7  ;;  %vm395_vm1 = vcmask 1027936   ;;  %vm428_vm3 = vcmask 273536  }
  0xe4   : > { %v535_v10 = vsel %vm313_vm8, %v533_v0, %v534_v8  ;;  %vm446_vm4 = vcmask 421136   ;;  %vm460_vm5 = vcmask 568736   ;;  %vm474_vm6 = vcmask 716336  }
  0xe5   : > { %vm524_vm8 = vcmask 113668   ;;  %vm553_vm14 = vcmask 404736   ;;  %vm558_vm15 = vcmask 552336   ;;  %v2180_v35 = vmov 0.0  }
  0xe6   : > { %425 = vrot.lane.b32.xlu1 %v424_v40, %s2167_s28  ;;  %406 = vrot.lane.b32.xlu0 %v405_v47, %s2168_s29  ;;  %v2182_v36 = vmov 0   ;;  %s1934_s28 = sshll.u32 %s2324_s5, 7 }
  0xe7   : > { %1949 = vmatprep.subr.bf16.mxu1 %v2180_v35  ;;  %769 = vmatprep.mubr.bf16.mxu0 %v2182_v36 }
  0xe8   : > { %2050 = vset.pattern.permute.xlu1 %v2182_v36  ;;  %2051 = vset.pattern.permute.xlu0 %v2182_v36 }
  0xea   : > { %517 = vrot.lane.b32.xlu1 %v516_v56, %s2169_s30  ;;  %392 = vrot.lane.b32.xlu0 %v391_v57, %s2170_s9  ;;  %s2184_s30 = smov 114  }
  0xee   : > { %503 = vrot.lane.b32.xlu1 %v502_v3, %s2171_s10  ;;  %485 = vrot.lane.b32.xlu0 %v484_v4, %s2172_s11  ;;  %s2186_s10 = smov 56   ;;  %s2187_s11 = smov 38  }
  0xf2   : > { %550 = vrot.lane.b32.xlu1 %v549_v9, %s2173_s6  ;;  %536 = vrot.lane.b32.xlu0 %v535_v10, %s2174_s7  ;;  %s2188_s6 = smov 20   ;;  %s2189_s7 = smov 112  }
  0xf6   : > { %555 = vrot.lane.b32.xlu0 %v535_v10, %s2175_s23  ;;  %s2190_s23 = smov 2  }
 0x138   : > { %v328_v1 = vpop.permute.xlu0 %327  ;;  %v333_v2 = vpop.permute.xlu1 %332 }
 0x139   : > { %331 = vst.msk [vmem:[#allocation2] sm:$0xf] %vm330_vm9, %v328_v1  ;;  %vm488_vm9 = vcmask 863936  }
 0x13a   : > { %336 = vst.msk [vmem:[#allocation2] sm:$0xf] %vm335_vm10, %v333_v2  ;;  %vm520_vm10 = vcmask 1014784  }
 0x13c   : > { %v347_v11 = vpop.permute.xlu0 %346  ;;  %v361_v12 = vpop.permute.xlu1 %360 }
 0x13d   : > { %350 = vst.msk [vmem:[#allocation2] sm:$0xf] %vm349_vm11, %v347_v11  ;;  %vm506_vm11 = vcmask 1011536  }
 0x13e   : > { %364 = vst.msk [vmem:[#allocation2] sm:$0xf] %vm363_vm12, %v361_v12  ;;  %vm525_vm12 = vmor %vm524_vm8, %vm523_vm7  ;;  %vm653_vm7 = vcmask 752640   ;;  %vm668_vm8 = vcmask 744448  }
 0x150   : > { %v444_v13 = vpop.permute.xlu0 %443  ;;  %v458_v14 = vpop.permute.xlu1 %457 }
 0x154   : > { %v472_v15 = vpop.permute.xlu0 %471  ;;  %v379_v16 = vpop.permute.xlu1 %378 }
 0x155   : > { %382 = vst.msk [vmem:[#allocation2] sm:$0xf] %vm381_vm13, %v379_v16  ;;  %vm539_vm13 = vcmask 257136  }
 0x158   : > { %v407_v20 = vpop.permute.xlu0 %406  ;;  %v426_v21 = vpop.permute.xlu1 %425 }
 0x159   : > { %v408_v22 = vrot.slane %v407_v20, 4 }
 0x15b   : > { %v410_v18 = vsel %vm409_vm0, %v408_v22, %v407_v20 }
 0x15c   : > { %v393_v5 = vpop.permute.xlu0 %392  ;;  %v518_v17 = vpop.permute.xlu1 %517 }
 0x15d   : > { %396 = vst.msk [vmem:[#allocation2] sm:$0xf] %vm395_vm1, %v393_v5  ;;  %v519_v23 = vrot.slane %v518_v17, 4  ;;  %vm568_vm1 = vcmask 240640  }
 0x15e   : > { %415 = vst.msk [vmem:[#allocation2] sm:$0xff] %vm414_vm2, %v410_v18  ;;  %vm2181_vm2 = vmmov 0  }
 0x15f   : > { %429 = vst.msk [vmem:[#allocation2 + $0x4] sm:$0xf] %vm428_vm3, %v426_v21  ;;  %v521_v26 = vsel %vm520_vm10, %v519_v23, %v518_v17  ;;  %1955 = vmatprep.mubr.msk.bf16.mxu1 %vm2181_vm2, %v2180_v35  ;;  %vm578_vm3 = vcmask 1039360   ;;  %vm727_vm10 = vcmask 1041408  }
 0x160   : > { %v486_v24 = vpop.permute.xlu0 %485  ;;  %447 = vst.msk [vmem:[#allocation2 + $0x4] sm:$0xf] %vm446_vm4, %v444_v13  ;;  %v504_v25 = vpop.permute.xlu1 %503  ;;  %vm608_vm4 = vcmask 900096  }
 0x161   : > { %461 = vst.msk [vmem:[#allocation2 + $0x4] sm:$0xf] %vm460_vm5, %v458_v14  ;;  %vm623_vm5 = vcmask 891904  }
 0x162   : > { %475 = vst.msk [vmem:[#allocation2 + $0x4] sm:$0xf] %vm474_vm6, %v472_v15  ;;  %vm638_vm6 = vcmask 883712  }
 0x163   : > { %489 = vst.msk [vmem:[#allocation2 + $0x4] sm:$0xf] %vm488_vm9, %v486_v24  ;;  %vm586_vm9 = vcmask 244740  }
 0x164   : > { %507 = vst.msk [vmem:[#allocation2 + $0x4] sm:$0xf] %vm506_vm11, %v504_v25  ;;  %v537_v27 = vpop.permute.xlu0 %536  ;;  %v551_v28 = vpop.permute.xlu1 %550  ;;  %vm723_vm11 = vcmask 293888  }
 0x165   : > { %526 = vst.msk [vmem:[#allocation2 + $0x4] sm:$0xff] %vm525_vm12, %v521_v26  ;;  %vm876_vm12 = vcmask 122880  }
 0x166   : > { %540 = vst.msk [vmem:[#allocation2 + $0x8] sm:$0xf] %vm539_vm13, %v537_v27  ;;  %vm1256_vm13 = vcmask 15360  }
 0x167   : > { %554 = vst.msk [vmem:[#allocation2 + $0x8] sm:$0xf] %vm553_vm14, %v551_v28  ;;  %vm1701_vm14 = vcmask 31744  }
 0x168   : > { %v556_v29 = vpop.permute.xlu0 %555 }
 0x169   : > { %559 = vst.msk [vmem:[#allocation2 + $0x8] sm:$0xf] %vm558_vm15, %v556_v29 }
 0x16c   : > { %v560_v30 = vld [vmem:[#allocation2] sm:$0xff] }
 0x16d   : > { %588 = vrot.lane.b32.xlu0 %v560_v30, %s2168_s29  ;;  %566 = vst [vmem:[#allocation3] sm:$0xf] %v560_v30  ;;  %574 = vrot.lane.b32.xlu1 %v560_v30, %s2156_s4  ;;  %v564_v31 = vcombine.high %v560_v30, %v560_v30  ;;  %v570_v33 = vcombine.low %v560_v30, %v560_v30 }
 0x16f   : > { %567 = vst [vmem:[#allocation3 + $0x8] sm:$0xf] %v564_v31 }
 0x170   : > { %v561_v32 = vld [vmem:[#allocation2 + $0x8] sm:$0xf] }
 0x171   : > { %634 = vrot.lane.b32.xlu0 %v560_v30, %s2170_s9  ;;  %604 = vrot.lane.b32.xlu1 %v560_v30, %s2176_s8  ;;  %569 = vst.msk [vmem:[#allocation3 + $0x10] sm:$0xf] %vm568_vm1, %v561_v32  ;;  %v571_v34 = vcombine.low %v561_v32, %v561_v32 }
 0x175   : > { %664 = vrot.lane.b32.xlu0 %v560_v30, %s2177_s17  ;;  %590 = vrot.lane.b32.xlu1 %v564_v31, %s2168_s29 }
 0x179   : > { %617 = vrot.lane.b32.xlu0 %v560_v30, %s2178_s19  ;;  %572 = vrot.lane.b32.xlu1 %v570_v33, %s2156_s4 }
 0x17d   : > { %647 = vrot.lane.b32.xlu0 %v560_v30, %s2179_s20  ;;  %602 = vrot.lane.b32.xlu1 %v570_v33, %s2176_s8 }
 0x181   : > { %619 = vrot.lane.b32.xlu0 %v564_v31, %s2178_s19  ;;  %632 = vrot.lane.b32.xlu1 %v570_v33, %s2170_s9 }
 0x185   : > { %649 = vrot.lane.b32.xlu0 %v564_v31, %s2179_s20  ;;  %662 = vrot.lane.b32.xlu1 %v570_v33, %s2177_s17 }
 0x189   : > { %621 = vrot.lane.b32.xlu1 %v561_v32, %s2178_s19  ;;  %592 = vrot.lane.b32.xlu0 %v561_v32, %s2168_s29  ;;  %s2650_s29 = scalar_lea.vmem [#allocation7], %s1934_s28  ;;  %s2192_s19 = smov 76  }
 0x18d   : > { %651 = vrot.lane.b32.xlu1 %v561_v32, %s2179_s20  ;;  %576 = vrot.lane.b32.xlu0 %v571_v34, %s2156_s4  ;;  %s2193_s4 = smov 58  }
 0x191   : > { %636 = vrot.lane.b32.xlu1 %v571_v34, %s2170_s9  ;;  %606 = vrot.lane.b32.xlu0 %v571_v34, %s2176_s8  ;;  %s2185_s9 = smov 74  }
 0x195   : > { %666 = vrot.lane.b32.xlu1 %v571_v34, %s2177_s17  ;;  %677 = vrot.lane.b32.xlu0 %v560_v30, %s2165_s26  ;;  %s2191_s17 = smov 94  }
 0x199   : > { %679 = vrot.lane.b32.xlu1 %v564_v31, %s2165_s26  ;;  %681 = vrot.lane.b32.xlu0 %v561_v32, %s2165_s26  ;;  %s2195_s26 = smov 22  }
 0x19d   : > { %720 = vperm.xlu1 %2050, %v717_v37  }
 0x1df   : > { %v589_v38 = vpop.permute.xlu0 %588  ;;  %v575_v39 = vpop.permute.xlu1 %574 }
 0x1e3   : > { %v635_v40 = vpop.permute.xlu0 %634  ;;  %v605_v41 = vpop.permute.xlu1 %604 }
 0x1e7   : > { %v665_v42 = vpop.permute.xlu0 %664  ;;  %v591_v43 = vpop.permute.xlu1 %590 }
 0x1e8   : > { %v594_v44 = vsel %vm409_vm0, %v589_v38, %v591_v43 }
 0x1e9   : > { %599 = vst [vmem:[#allocation3 + $0x18] sm:$0xf] %v594_v44 }
 0x1eb   : > { %v618_v46 = vpop.permute.xlu0 %617  ;;  %v573_v47 = vpop.permute.xlu1 %572 }
 0x1ec   : > { %v579_v45 = vsel %vm578_vm3, %v573_v47, %v575_v39 }
 0x1ed   : > { %584 = vst [vmem:[#allocation3] sm:$0xf0] %v579_v45 }
 0x1ef   : > { %v648_v48 = vpop.permute.xlu0 %647  ;;  %v603_v49 = vpop.permute.xlu1 %602 }
 0x1f0   : > { %v609_v50 = vsel %vm608_vm4, %v603_v49, %v605_v41 }
 0x1f1   : > { %614 = vst [vmem:[#allocation3 + $0x18] sm:$0xf0] %v609_v50 }
 0x1f3   : > { %v620_v51 = vpop.permute.xlu0 %619  ;;  %v633_v53 = vpop.permute.xlu1 %632 }
 0x1f4   : > { %v624_v19 = vsel %vm623_vm5, %v618_v46, %v620_v51  ;;  %v639_v52 = vsel %vm638_vm6, %v633_v53, %v635_v40  ;;  %v692_v17 = vld [vmem:[#allocation3] sm:$0xff] }
 0x1f5   : > { %629 = vst [vmem:[#allocation3 + $0x30] sm:$0xf] %v624_v19  ;;  %644 = vst [vmem:[#allocation3 + $0x30] sm:$0xf0] %v639_v52 }
 0x1f7   : > { %v650_v54 = vpop.permute.xlu0 %649  ;;  %v663_v55 = vpop.permute.xlu1 %662 }
 0x1f8   : > { %v654_v56 = vsel %vm653_vm7, %v648_v48, %v650_v54  ;;  %v669_v57 = vsel %vm668_vm8, %v663_v55, %v665_v42  ;;  %v695_v14 = vld [vmem:[#allocation3 + $0x18] sm:$0xff] }
 0x1f9   : > { %659 = vst [vmem:[#allocation3 + $0x48] sm:$0xf] %v654_v56  ;;  %674 = vst [vmem:[#allocation3 + $0x48] sm:$0xf0] %v669_v57  ;;  %v707_v18 = vpack.c.bf16 %v695_v14, %v692_v17 }
 0x1fb   : > { %v593_v58 = vpop.permute.xlu0 %592  ;;  %v622_v59 = vpop.permute.xlu1 %621 }
 0x1fc   : > { %v595_v60 = vsel %vm409_vm0, %v591_v43, %v593_v58  ;;  %601 = vst.msk [vmem:[#allocation3 + $0x28] sm:$0xf] %vm568_vm1, %v593_v58  ;;  %v625_v61 = vsel %vm623_vm5, %v620_v51, %v622_v59  ;;  %631 = vst.msk [vmem:[#allocation3 + $0x40] sm:$0xf] %vm568_vm1, %v622_v59  ;;  %vm683_vm0 = vcmask 736256   ;;  %v698_v30 = vld [vmem:[#allocation3 + $0x30] sm:$0xff]  ;;  %v823_v43 = vlaneseq }
 0x1fd   : > { %600 = vst [vmem:[#allocation3 + $0x20] sm:$0xf] %v595_v60  ;;  %630 = vst [vmem:[#allocation3 + $0x38] sm:$0xf] %v625_v61 }
 0x1fe   : > { %v2610_v46 = vshrl.u32 %v823_v43, 7 }
 0x1ff   : > { %v577_v62 = vpop.permute.xlu0 %576  ;;  %v652_v0 = vpop.permute.xlu1 %651 }
 0x200   : > { %v580_v63 = vsel %vm578_vm3, %v575_v39, %v577_v62  ;;  %587 = vst.msk [vmem:[#allocation3 + $0x10] sm:$0xf0] %vm586_vm9, %v577_v62  ;;  %v655_v3 = vsel %vm653_vm7, %v650_v54, %v652_v0  ;;  %v701_v25 = vld [vmem:[#allocation3 + $0x48] sm:$0xff]  ;;  %v2619_v54 = vsub.s32 0, %v2610_v46 }
 0x201   : > { %661 = vst.msk [vmem:[#allocation3 + $0x58] sm:$0xf] %vm568_vm1, %v652_v0  ;;  %585 = vst [vmem:[#allocation3 + $0x8] sm:$0xf0] %v580_v63  ;;  %v710_v31 = vpack.c.bf16 %v701_v25, %v698_v30 }
 0x202   : > { %660 = vst [vmem:[#allocation3 + $0x50] sm:$0xf] %v655_v3 }
 0x203   : > { %v607_v4 = vpop.permute.xlu0 %606  ;;  %v637_v6 = vpop.permute.xlu1 %636 }
 0x204   : > { %v610_v7 = vsel %vm608_vm4, %v605_v41, %v607_v4  ;;  %616 = vst.msk [vmem:[#allocation3 + $0x28] sm:$0xf0] %vm586_vm9, %v607_v4  ;;  %v640_v8 = vsel %vm638_vm6, %v635_v40, %v637_v6  ;;  %646 = vst.msk [vmem:[#allocation3 + $0x40] sm:$0xf0] %vm586_vm9, %v637_v6  ;;  %v716_v41 = vld [vmem:[%s3537_s1] sm:$0xf] }
 0x205   : > { %615 = vst [vmem:[#allocation3 + $0x20] sm:$0xf0] %v610_v7  ;;  %645 = vst [vmem:[#allocation3 + $0x38] sm:$0xf0] %v640_v8 }
 0x207   : > { %v678_v9 = vpop.permute.xlu0 %677  ;;  %v667_v10 = vpop.permute.xlu1 %666  ;;  %v694_v12 = vld [vmem:[#allocation3 + $0x10] sm:$0xff] }
 0x208   : > { %v670_v1 = vsel %vm668_vm8, %v665_v42, %v667_v10  ;;  %676 = vst.msk [vmem:[#allocation3 + $0x58] sm:$0xf0] %vm586_vm9, %v667_v10  ;;  %v693_v21 = vld [vmem:[#allocation3 + $0x8] sm:$0xff] }
 0x209   : > { %675 = vst [vmem:[#allocation3 + $0x50] sm:$0xf0] %v670_v1 }
 0x20b   : > { %v682_v2 = vpop.permute.xlu0 %681  ;;  %v680_v11 = vpop.permute.xlu1 %679  ;;  %v697_v13 = vld [vmem:[#allocation3 + $0x28] sm:$0xff]  ;;  %v700_v23 = vld [vmem:[#allocation3 + $0x40] sm:$0xff] }
 0x20c   : > { %691 = vst.msk [vmem:[#allocation3 + $0x70] sm:$0xf] %vm568_vm1, %v682_v2  ;;  %v684_v15 = vsel %vm683_vm0, %v678_v9, %v680_v11  ;;  %v685_v16 = vsel %vm683_vm0, %v680_v11, %v682_v2  ;;  %v709_v20 = vpack.c.bf16 %v697_v13, %v694_v12  ;;  %v696_v22 = vld [vmem:[#allocation3 + $0x20] sm:$0xff]  ;;  %v699_v27 = vld [vmem:[#allocation3 + $0x38] sm:$0xff] }
 0x20d   : > { %689 = vst [vmem:[#allocation3 + $0x60] sm:$0xf] %v684_v15  ;;  %690 = vst [vmem:[#allocation3 + $0x68] sm:$0xf] %v685_v16  ;;  %v708_v5 = vpack.c.bf16 %v696_v22, %v693_v21 }
 0x20e   : > { %1950 = vmatpush3.bf16.msra.mxu1 %v709_v20 }
 0x20f   : > { %737 = vmatprep.subr.bf16.mxu0 %v708_v5  ;;  %1951 = vmatprep.subr.bf16.mxu1 %v2180_v35  ;;  %v703_v24 = vld [vmem:[#allocation3 + $0x58] sm:$0xff] }
 0x210   : > { %738 = vmatpush1.bf16.msra.mxu0 %v707_v18  ;;  %v712_v26 = vpack.c.bf16 %v703_v24, %v700_v23  ;;  %v702_v28 = vld [vmem:[#allocation3 + $0x50] sm:$0xff] }
 0x211   : > { %v711_v29 = vpack.c.bf16 %v702_v28, %v699_v27 }
 0x212   : > { %1952 = vmatpush3.bf16.msra.mxu1 %v712_v26 }
 0x213   : > { %739 = vmatprep.subr.bf16.mxu0 %v711_v29  ;;  %1953 = vmatprep.subr.bf16.mxu1 %v2180_v35  ;;  %v706_v32 = vld [vmem:[#allocation3 + $0x70] sm:$0xf]  ;;  %v2183_v35 = vmov 1966171168  }
 0x214   : > { %740 = vmatpush1.bf16.msra.mxu0 %v710_v31  ;;  %v705_v33 = vld [vmem:[#allocation3 + $0x68] sm:$0xf]  ;;  %v715_v34 = vpack.c.bf16 %v706_v32, %v706_v32  ;;  %v704_v36 = vld [vmem:[#allocation3 + $0x60] sm:$0xf]  ;;  %v821_v42 = vunpack.c.l.s4 %v2183_v35 }
 0x215   : > { %v714_v37 = vpack.c.bf16 %v705_v33, %v705_v33  ;;  %v713_v38 = vpack.c.bf16 %v704_v36, %v704_v36 }
 0x216   : > { %v735_v39 = vsel %vm727_vm10, %v715_v34, 0  ;;  %v822_v44 = vunpack.c.0.s8 %v821_v42 }
 0x217   : > { %1935 = vmatprep.subr.msk.bf16.mxu0 %vm727_vm10, %v714_v37  ;;  %1954 = vmatpush3.bf16.msra.mxu1 %v735_v39  ;;  %v729_v40 = vsel %vm727_vm10, %v713_v38, 0 }
 0x218   : > { %742 = vmatpush1.bf16.msra.mxu0 %v729_v40  ;;  %v2613_v45 = vsub.s32 %v822_v44, %v2610_v46 }
 0x21a   : > { %1956 = vmatmul.mubr.msk.bf16.vlgmr.msra.gmra.mrb[0].mxu1 %vm723_vm11, %v716_v41 }
 0x21b   : > { %1936 = vmatmul.mubr.msk.bf16.vlgmr.msra.gmra.mrb[0].mxu0 %vm723_vm11, %v716_v41 }
 0x21c   : > { %v721_v47 = vpop.permute.xlu1 %720 }
 0x2ed   : > { %v812_v48 = vpop.f32.mrb[0].mxu1 }
 0x2ee   : > { %v2615_v49 = vadd.f32 %v812_v48, %v721_v47  ;;  %v771_v50 = vpop.f32.mrb[0].mxu0  ;;  %v1957_v51 = vpop.f32.mrb[1].mxu1  ;;  %v2739_v48 = vsub.s32 1, %v2610_v46 }
 0x2ef   : > { %v772_v53 = vadd.f32 %v771_v50, %v721_v47  ;;  %v773_v19 = vpop.f32.mrb[1].mxu0  ;;  %v815_v52 = vpop.f32.mrb[2].mxu1 }
 0x2f0   : > { %v2621_v55 = vadd.f32 %v773_v19, %v721_v47  ;;  %v775_v56 = vpop.f32.mrb[2].mxu0  ;;  %v1958_v57 = vpop.f32.mrb[3].mxu1  ;;  %v1733_v58 = vrot.slane %v2615_v49, %v2613_v45  ;;  %v1726_v59 = vcombine.high %v2615_v49, %v2615_v49 }
 0x2f1   : > { %v819_v60 = vcombine.high %v772_v53, %v772_v53  ;;  %v826_v61 = vrot.slane %v772_v53, %v2613_v45  ;;  %v776_v62 = vpop.f32.mrb[3].mxu0 }
 0x2f2   : > { %v1281_v0 = vcombine.high %v2621_v55, %v2621_v55  ;;  %v2631_v63 = vrot.slane %v1733_v58, %v2613_v45  ;;  %v1741_v3 = vcombine.high %v1733_v58, %v1733_v58  ;;  %v1288_v8 = vrot.slane %v2621_v55, %v2613_v45 }
 0x2f3   : > { %v833_v4 = vrot.slane %v819_v60, %v2613_v45  ;;  %v834_v6 = vcombine.high %v826_v61, %v826_v61  ;;  %v842_v7 = vrot.slane %v826_v61, %v2613_v45  ;;  %v1740_v2 = vrot.slane %v1726_v59, %v2613_v45 }
 0x2f4   : > { %v2638_v9 = vrot.slane %v1281_v0, %v2613_v45  ;;  %v1778_v10 = vrot.slane %v2631_v63, %v2619_v54  ;;  %v2643_v1 = vrot.slane %v1741_v3, %v2613_v45  ;;  %v1296_v18 = vcombine.high %v1288_v8, %v1288_v8 }
 0x2f5   : > { %v835_v11 = vcombine.high %v833_v4, %v833_v4  ;;  %v849_v12 = vrot.slane %v833_v4, %v2613_v45  ;;  %v856_v13 = vrot.slane %v834_v6, %v2613_v45  ;;  %v2648_v14 = vcombine.high %v842_v7, %v842_v7  ;;  %877 = vst.msk [vmem:[%s2650_s29] sm:$0x1] %vm876_vm12, %v842_v7 }
 0x2f6   : > { %1807 = vrot.lane.b32.xlu0 %v1778_v10, %s2184_s30  ;;  %v1782_v15 = vrot.slane %v2643_v1, %v2619_v54  ;;  %v2668_v22 = vrot.slane %v842_v7, %v2619_v54  ;;  %v1742_v23 = vcombine.high %v1740_v2, %v1740_v2  ;;  %v1110_v25 = vcombine.low %v772_v53, %v2621_v55 }
 0x2f7   : > { %v863_v16 = vrot.slane %v835_v11, %v2613_v45  ;;  %v2658_v20 = vcombine.high %v849_v12, %v849_v12  ;;  %v866_v21 = vcombine.high %v856_v13, %v856_v13  ;;  %878 = vst.msk [vmem:[%s2650_s29 + $0x10] sm:$0x1] %vm876_vm12, %v856_v13  ;;  %879 = vst.msk [vmem:[%s2650_s29 + $0x20] sm:$0x1] %vm876_vm12, %v2648_v14 }
 0x2f8   : > { %881 = vst.msk [vmem:[%s2650_s29 + $0x40] sm:$0x1] %vm876_vm12, %v849_v12  ;;  %v2671_v5 = vrot.slane %v849_v12, %v2619_v54  ;;  %1809 = vrot.lane.b32.xlu1 %v1782_v15, %s2184_s30  ;;  %v2684_v24 = vrot.slane %v856_v13, %v2619_v54  ;;  %v1111_v26 = vcombine.high %v772_v53, %v2621_v55 }
 0x2f9   : > { %v2674_v17 = vcombine.high %v863_v16, %v863_v16  ;;  %880 = vst.msk [vmem:[%s2650_s29 + $0x30] sm:$0x1] %vm876_vm12, %v866_v21  ;;  %882 = vst.msk [vmem:[%s2650_s29 + $0x50] sm:$0x1] %vm876_vm12, %v863_v16  ;;  %v1555_v27 = vcombine.low %v2621_v55, %v2615_v49  ;;  %v2696_v28 = vrot.slane %v1288_v8, %v2613_v45 }
 0x2fa   : > { %883 = vst.msk [vmem:[%s2650_s29 + $0x60] sm:$0x1] %vm876_vm12, %v2658_v20  ;;  %917 = vrot.lane.b32.xlu0 %v2668_v22, %s2176_s8  ;;  %v2701_v29 = vrot.slane %v1740_v2, %v2613_v45  ;;  %v1118_v30 = vrot.slane %v1110_v25, %v2613_v45  ;;  %v1125_v31 = vrot.slane %v1111_v26, %v2613_v45 }
 0x2fb   : > { %884 = vst.msk [vmem:[%s2650_s29 + $0x70] sm:$0x1] %vm876_vm12, %v2674_v17  ;;  %v1563_v32 = vrot.slane %v1555_v27, %v2613_v45  ;;  %v2707_v33 = vrot.slane %v1742_v23, %v2613_v45  ;;  %v2710_v34 = vrot.slane %v1296_v18, %v2613_v45  ;;  %v1556_v36 = vcombine.high %v2621_v55, %v2615_v49 }
 0x2fc   : > { %919 = vrot.lane.b32.xlu1 %v2684_v24, %s2176_s8  ;;  %v2715_v37 = vrot.slane %v866_v21, %v2619_v54  ;;  %v1126_v38 = vcombine.high %v1118_v30, %v1118_v30  ;;  %v2720_v39 = vrot.slane %v1118_v30, %v2613_v45  ;;  %v1127_v40 = vcombine.high %v1125_v31, %v1125_v31 }
 0x2fd   : > { %v2723_v41 = vrot.slane %v1125_v31, %v2613_v45  ;;  %v2726_v35 = vrot.slane %v1563_v32, %v2613_v45  ;;  %v1570_v42 = vrot.slane %v1556_v36, %v2613_v45  ;;  %v2730_v43 = vrot.slane %v863_v16, %v2619_v54 }
 0x2fe   : > { %949 = vrot.lane.b32.xlu0 %v2668_v22, %s2179_s20  ;;  %v1326_v44 = vcombine.high %v2696_v28, %v2696_v28  ;;  %v1771_v47 = vcombine.high %v2631_v63, %v2631_v63  ;;  %v1163_v49 = vrot.slane %v2720_v39, %v2619_v54  ;;  %v1772_v51 = vcombine.high %v2701_v29, %v2701_v29 }
 0x2ff   : > { %v1195_v50 = vrot.slane %v2723_v41, %v2619_v54  ;;  %v2748_v53 = vrot.slane %v1570_v42, %v2613_v45  ;;  %v1311_v52 = vrot.slane %v2638_v9, %v2613_v45  ;;  %v2758_v46 = vrot.slane %v1126_v38, %v2613_v45 }
 0x300   : > { %951 = vrot.lane.b32.xlu1 %v2684_v24, %s2179_s20  ;;  %v2751_v19 = vrot.slane %v1326_v44, %v2619_v54  ;;  %v2762_v55 = vcombine.high %v2720_v39, %v2720_v39  ;;  %v2765_v56 = vrot.slane %v1127_v40, %v2613_v45  ;;  %v2769_v57 = vcombine.high %v2723_v41, %v2723_v41 }
 0x301   : > { %v1774_v58 = vcombine.high %v2707_v33, %v2707_v33  ;;  %v2774_v59 = vrot.slane %v1311_v52, %v2619_v54  ;;  %v1328_v60 = vcombine.high %v2710_v34, %v2710_v34  ;;  %v1297_v61 = vcombine.high %v2638_v9, %v2638_v9 }
 0x302   : > { %981 = vrot.lane.b32.xlu0 %v2668_v22, %s2185_s9  ;;  %v1175_v62 = vrot.slane %v2758_v46, %v2739_v48  ;;  %v1183_v0 = vrot.slane %v2762_v55, %v2739_v48  ;;  %v1207_v3 = vrot.slane %v2765_v56, %v2739_v48  ;;  %v1215_v4 = vrot.slane %v2769_v57, %v2739_v48 }
 0x303   : > { %v2791_v6 = vrot.slane %v1328_v60, %v2619_v54  ;;  %v1325_v7 = vrot.slane %v1297_v61, %v2613_v45  ;;  %v1608_v8 = vrot.slane %v2726_v35, %v2619_v54  ;;  %v1640_v9 = vrot.slane %v2748_v53, %v2619_v54 }
 0x304   : > { %983 = vrot.lane.b32.xlu1 %v2684_v24, %s2185_s9  ;;  %v2802_v10 = vrot.slane %v2658_v20, %v2619_v54  ;;  %v1571_v2 = vcombine.high %v1563_v32, %v1563_v32  ;;  %v2806_v11 = vcombine.high %v2726_v35, %v2726_v35  ;;  %v1572_v12 = vcombine.high %v1570_v42, %v1570_v42 }
 0x305   : > { %v2809_v13 = vrot.slane %v1325_v7, %v2619_v54  ;;  %v2813_v15 = vcombine.high %v2748_v53, %v2748_v53  ;;  %v1171_v16 = vrot.slane %v2758_v46, %v2619_v54  ;;  %v1179_v20 = vrot.slane %v2762_v55, %v2619_v54 }
 0x306   : > { %1013 = vrot.lane.b32.xlu0 %v2668_v22, %s2186_s10  ;;  %v2822_v21 = vrot.slane %v1571_v2, %v2613_v45  ;;  %v1628_v18 = vrot.slane %v2806_v11, %v2739_v48  ;;  %v2827_v23 = vrot.slane %v1572_v12, %v2613_v45  ;;  %v1203_v25 = vrot.slane %v2765_v56, %v2619_v54 }
 0x307   : > { %v1660_v26 = vrot.slane %v2813_v15, %v2739_v48  ;;  %v2835_v27 = vrot.slane %v2674_v17, %v2619_v54  ;;  %v1211_v30 = vrot.slane %v2769_v57, %v2619_v54  ;;  %v1327_v31 = vcombine.high %v1311_v52, %v1311_v52 }
 0x308   : > { %1015 = vrot.lane.b32.xlu1 %v2684_v24, %s2186_s10  ;;  %v1620_v45 = vrot.slane %v2822_v21, %v2739_v48  ;;  %v1652_v32 = vrot.slane %v2827_v23, %v2739_v48  ;;  %v2847_v36 = vcombine.high %v2758_v46, %v2758_v46  ;;  %v1616_v17 = vrot.slane %v2822_v21, %v2619_v54 }
 0x309   : > { %v2852_v38 = vrot.slane %v1327_v31, %v2619_v54  ;;  %v2856_v40 = vcombine.high %v2765_v56, %v2765_v56  ;;  %v1329_v44 = vcombine.high %v1325_v7, %v1325_v7  ;;  %v2879_v42 = vcombine.high %v2822_v21, %v2822_v21 }
 0x30a   : > { %1045 = vrot.lane.b32.xlu0 %v2668_v22, %s2187_s11  ;;  %v1191_v52 = vrot.slane %v2847_v36, %v2739_v48  ;;  %v1773_v2 = vcombine.high %v2643_v1, %v2643_v1  ;;  %v2887_v61 = vcombine.high %v2827_v23, %v2827_v23  ;;  %v2896_v31 = vrot.slane %v1774_v58, %v2619_v54 }
 0x30b   : > { %v1223_v12 = vrot.slane %v2856_v40, %v2739_v48  ;;  %v2873_v7 = vrot.slane %v1329_v44, %v2619_v54  ;;  %v2893_v44 = vrot.slane %v1772_v51, %v2619_v54  ;;  %v1786_v1 = vrot.slane %v1771_v47, %v2619_v54 }
 0x30c   : > { %1047 = vrot.lane.b32.xlu1 %v2684_v24, %s2187_s11  ;;  %v1668_v51 = vrot.slane %v2887_v61, %v2739_v48  ;;  %v1664_v58 = vrot.slane %v2887_v61, %v2619_v54  ;;  %v1790_v60 = vrot.slane %v1773_v2, %v2619_v54  ;;  %v1798_v63 = vrot.slane %v2707_v33, %v2619_v54 }
 0x30d   : > { %v1333_v47 = vrot.slane %v2696_v28, %v2619_v54  ;;  %v1167_v2 = vrot.slane %v2720_v39, %v2739_v48  ;;  %v1337_v28 = vrot.slane %v2710_v34, %v2619_v54  ;;  %v896_v33 = vrot.slane %v2648_v14, %v2619_v54 }
 0x30e   : > { %1077 = vrot.lane.b32.xlu0 %v2668_v22, %s2188_s6  ;;  %v1632_v22 = vrot.slane %v2879_v42, %v2619_v54  ;;  %v1612_v34 = vrot.slane %v2726_v35, %v2739_v48  ;;  %v1644_v14 = vrot.slane %v2748_v53, %v2739_v48 }
 0x310   : > { %1079 = vrot.lane.b32.xlu1 %v2684_v24, %s2188_s6  ;;  %v1794_v24 = vrot.slane %v2701_v29, %v2619_v54  ;;  %v1199_v29 = vrot.slane %v2723_v41, %v2739_v48 }
 0x312   : > { %1811 = vrot.lane.b32.xlu0 %v1786_v1, %s2184_s30 }
 0x314   : > { %1813 = vrot.lane.b32.xlu1 %v1790_v60, %s2184_s30 }
 0x316   : > { %1815 = vrot.lane.b32.xlu0 %v1794_v24, %s2184_s30 }
 0x318   : > { %1817 = vrot.lane.b32.xlu1 %v1798_v63, %s2184_s30 }
 0x31a   : > { %1362 = vrot.lane.b32.xlu0 %v1333_v47, %s2189_s7 }
 0x31c   : > { %1226 = vrot.lane.b32.xlu1 %v1167_v2, %s2190_s23 }
 0x31e   : > { %1394 = vrot.lane.b32.xlu0 %v1333_v47, %s2191_s17 }
 0x320   : > { %1242 = vrot.lane.b32.xlu1 %v1199_v29, %s2190_s23 }
 0x322   : > { %1426 = vrot.lane.b32.xlu0 %v1333_v47, %s2192_s19 }
 0x324   : > { %1364 = vrot.lane.b32.xlu1 %v1337_v28, %s2189_s7 }
 0x326   : > { %1458 = vrot.lane.b32.xlu0 %v1333_v47, %s2193_s4 }
 0x328   : > { %1396 = vrot.lane.b32.xlu1 %v1337_v28, %s2191_s17 }
 0x32a   : > { %1490 = vrot.lane.b32.xlu0 %v1333_v47, %s2194_s22 }
 0x32c   : > { %1428 = vrot.lane.b32.xlu1 %v1337_v28, %s2192_s19 }
 0x32e   : > { %1522 = vrot.lane.b32.xlu0 %v1333_v47, %s2195_s26 }
 0x330   : > { %1460 = vrot.lane.b32.xlu1 %v1337_v28, %s2193_s4 }
 0x332   : > { %921 = vrot.lane.b32.xlu0 %v896_v33, %s2176_s8 }
 0x334   : > { %1492 = vrot.lane.b32.xlu1 %v1337_v28, %s2194_s22 }
 0x336   : > { %925 = vrot.lane.b32.xlu0 %v2671_v5, %s2176_s8 }
 0x338   : > { %1524 = vrot.lane.b32.xlu1 %v1337_v28, %s2195_s26 }
 0x33a   : > { %953 = vrot.lane.b32.xlu0 %v896_v33, %s2179_s20 }
 0x33c   : > { %1671 = vrot.lane.b32.xlu1 %v1612_v34, %s2196_s27 }
 0x33e   : > { %957 = vrot.lane.b32.xlu0 %v2671_v5, %s2179_s20 }
 0x340   : > { %1687 = vrot.lane.b32.xlu1 %v1644_v14, %s2196_s27 }
 0x342   : > { %985 = vrot.lane.b32.xlu0 %v896_v33, %s2185_s9 }
 0x344   : > { %923 = vrot.lane.b32.xlu1 %v2715_v37, %s2176_s8 }
 0x346   : > { %989 = vrot.lane.b32.xlu0 %v2671_v5, %s2185_s9 }
 0x348   : > { %927 = vrot.lane.b32.xlu1 %v2730_v43, %s2176_s8 }
 0x34a   : > { %1017 = vrot.lane.b32.xlu0 %v896_v33, %s2186_s10 }
 0x34c   : > { %955 = vrot.lane.b32.xlu1 %v2715_v37, %s2179_s20 }
 0x34e   : > { %1021 = vrot.lane.b32.xlu0 %v2671_v5, %s2186_s10 }
 0x350   : > { %959 = vrot.lane.b32.xlu1 %v2730_v43, %s2179_s20 }
 0x352   : > { %1049 = vrot.lane.b32.xlu0 %v896_v33, %s2187_s11 }
 0x354   : > { %987 = vrot.lane.b32.xlu1 %v2715_v37, %s2185_s9 }
 0x356   : > { %1053 = vrot.lane.b32.xlu0 %v2671_v5, %s2187_s11 }
 0x358   : > { %991 = vrot.lane.b32.xlu1 %v2730_v43, %s2185_s9 }
 0x35a   : > { %1081 = vrot.lane.b32.xlu0 %v896_v33, %s2188_s6 }
 0x35c   : > { %1019 = vrot.lane.b32.xlu1 %v2715_v37, %s2186_s10 }
 0x35e   : > { %1085 = vrot.lane.b32.xlu0 %v2671_v5, %s2188_s6 }
 0x360   : > { %1023 = vrot.lane.b32.xlu1 %v2730_v43, %s2186_s10 }
 0x362   : > { %1224 = vrot.lane.b32.xlu0 %v1163_v49, %s2190_s23 }
 0x364   : > { %1051 = vrot.lane.b32.xlu1 %v2715_v37, %s2187_s11 }
 0x366   : > { %1240 = vrot.lane.b32.xlu0 %v1195_v50, %s2190_s23 }
 0x368   : > { %v1808_v60 = vpop.permute.xlu0 %1807  ;;  %1055 = vrot.lane.b32.xlu1 %v2730_v43, %s2187_s11 }
 0x369   : > { %1831 = vst.msk [vmem:[%s2650_s29 + $0xf] sm:$0x1] %vm876_vm12, %v1808_v60 }
 0x36a   : > { %v1810_v5 = vpop.permute.xlu1 %1809  ;;  %1366 = vrot.lane.b32.xlu0 %v2751_v19, %s2189_s7 }
 0x36b   : > { %1832 = vst.msk [vmem:[%s2650_s29 + $0x1f] sm:$0x1] %vm876_vm12, %v1810_v5 }
 0x36c   : > { %v918_v39 = vpop.permute.xlu0 %917  ;;  %1083 = vrot.lane.b32.xlu1 %v2715_v37, %s2188_s6 }
 0x36d   : > { %941 = vst.msk [vmem:[%s2650_s29 + $0x1] sm:$0x1] %vm876_vm12, %v918_v39 }
 0x36e   : > { %v920_v41 = vpop.permute.xlu1 %919  ;;  %1370 = vrot.lane.b32.xlu0 %v2774_v59, %s2189_s7 }
 0x36f   : > { %942 = vst.msk [vmem:[%s2650_s29 + $0x11] sm:$0x1] %vm876_vm12, %v920_v41 }
 0x370   : > { %v950_v49 = vpop.permute.xlu0 %949  ;;  %1087 = vrot.lane.b32.xlu1 %v2730_v43, %s2188_s6 }
 0x371   : > { %973 = vst.msk [vmem:[%s2650_s29 + $0x2] sm:$0x1] %vm876_vm12, %v950_v49 }
 0x372   : > { %v952_v50 = vpop.permute.xlu1 %951  ;;  %1398 = vrot.lane.b32.xlu0 %v2751_v19, %s2191_s17 }
 0x373   : > { %974 = vst.msk [vmem:[%s2650_s29 + $0x12] sm:$0x1] %vm876_vm12, %v952_v50 }
 0x374   : > { %v982_v37 = vpop.permute.xlu0 %981  ;;  %1230 = vrot.lane.b32.xlu1 %v1175_v62, %s2190_s23 }
 0x375   : > { %1005 = vst.msk [vmem:[%s2650_s29 + $0x3] sm:$0x1] %vm876_vm12, %v982_v37 }
 0x376   : > { %v984_v43 = vpop.permute.xlu1 %983  ;;  %1402 = vrot.lane.b32.xlu0 %v2774_v59, %s2191_s17 }
 0x377   : > { %1006 = vst.msk [vmem:[%s2650_s29 + $0x13] sm:$0x1] %vm876_vm12, %v984_v43 }
 0x378   : > { %v1014_v1 = vpop.permute.xlu0 %1013  ;;  %1234 = vrot.lane.b32.xlu1 %v1183_v0, %s2190_s23 }
 0x379   : > { %1037 = vst.msk [vmem:[%s2650_s29 + $0x4] sm:$0x1] %vm876_vm12, %v1014_v1 }
 0x37a   : > { %v1016_v62 = vpop.permute.xlu1 %1015  ;;  %1430 = vrot.lane.b32.xlu0 %v2751_v19, %s2192_s19 }
 0x37b   : > { %1038 = vst.msk [vmem:[%s2650_s29 + $0x14] sm:$0x1] %vm876_vm12, %v1016_v62 }
 0x37c   : > { %v1046_v24 = vpop.permute.xlu0 %1045  ;;  %1246 = vrot.lane.b32.xlu1 %v1207_v3, %s2190_s23 }
 0x37d   : > { %1069 = vst.msk [vmem:[%s2650_s29 + $0x5] sm:$0x1] %vm876_vm12, %v1046_v24 }
 0x37e   : > { %v1048_v0 = vpop.permute.xlu1 %1047  ;;  %1434 = vrot.lane.b32.xlu0 %v2774_v59, %s2192_s19 }
 0x37f   : > { %1070 = vst.msk [vmem:[%s2650_s29 + $0x15] sm:$0x1] %vm876_vm12, %v1048_v0 }
 0x380   : > { %v1078_v63 = vpop.permute.xlu0 %1077  ;;  %1250 = vrot.lane.b32.xlu1 %v1215_v4, %s2190_s23 }
 0x381   : > { %1101 = vst.msk [vmem:[%s2650_s29 + $0x6] sm:$0x1] %vm876_vm12, %v1078_v63 }
 0x382   : > { %v1080_v3 = vpop.permute.xlu1 %1079  ;;  %1462 = vrot.lane.b32.xlu0 %v2751_v19, %s2193_s4 }
 0x383   : > { %1102 = vst.msk [vmem:[%s2650_s29 + $0x16] sm:$0x1] %vm876_vm12, %v1080_v3 }
 0x384   : > { %v1812_v47 = vpop.permute.xlu0 %1811  ;;  %1368 = vrot.lane.b32.xlu1 %v2791_v6, %s2189_s7 }
 0x385   : > { %1833 = vst.msk [vmem:[%s2650_s29 + $0x2f] sm:$0x1] %vm876_vm12, %v1812_v47 }
 0x386   : > { %v1814_v2 = vpop.permute.xlu1 %1813  ;;  %1466 = vrot.lane.b32.xlu0 %v2774_v59, %s2193_s4 }
 0x387   : > { %1834 = vst.msk [vmem:[%s2650_s29 + $0x3f] sm:$0x1] %vm876_vm12, %v1814_v2 }
 0x388   : > { %v1816_v4 = vpop.permute.xlu0 %1815  ;;  %1372 = vrot.lane.b32.xlu1 %v2809_v13, %s2189_s7 }
 0x389   : > { %1835 = vst.msk [vmem:[%s2650_s29 + $0x4f] sm:$0x1] %vm876_vm12, %v1816_v4 }
 0x38a   : > { %v1818_v29 = vpop.permute.xlu1 %1817  ;;  %1494 = vrot.lane.b32.xlu0 %v2751_v19, %s2194_s22 }
 0x38b   : > { %1836 = vst.msk [vmem:[%s2650_s29 + $0x5f] sm:$0x1] %vm876_vm12, %v1818_v29 }
 0x38c   : > { %v1363_v28 = vpop.permute.xlu0 %1362  ;;  %1400 = vrot.lane.b32.xlu1 %v2791_v6, %s2191_s17 }
 0x38d   : > { %1386 = vst.msk [vmem:[%s2650_s29 + $0x8] sm:$0x1] %vm876_vm12, %v1363_v28 }
 0x38e   : > { %v3079_v33 = vpop.permute.xlu1 %1226  ;;  %1498 = vrot.lane.b32.xlu0 %v2774_v59, %s2194_s22 }
 0x390   : > { %v1395_v34 = vpop.permute.xlu0 %1394  ;;  %1404 = vrot.lane.b32.xlu1 %v2809_v13, %s2191_s17 }
 0x391   : > { %1418 = vst.msk [vmem:[%s2650_s29 + $0x9] sm:$0x1] %vm876_vm12, %v1395_v34  ;;  %v3548_v34 = vrot.slane %v2813_v15, %v2619_v54  ;;  %v3549_v15 = vrot.slane %v2847_v36, %v2619_v54 }
 0x392   : > { %v3087_v14 = vpop.permute.xlu1 %1242  ;;  %1669 = vrot.lane.b32.xlu0 %v1608_v8, %s2196_s27 }
 0x394   : > { %v1427_v60 = vpop.permute.xlu0 %1426  ;;  %1432 = vrot.lane.b32.xlu1 %v2791_v6, %s2192_s19 }
 0x395   : > { %1450 = vst.msk [vmem:[%s2650_s29 + $0xa] sm:$0x1] %vm876_vm12, %v1427_v60 }
 0x396   : > { %v1365_v5 = vpop.permute.xlu1 %1364  ;;  %1685 = vrot.lane.b32.xlu0 %v1640_v9, %s2196_s27 }
 0x397   : > { %1387 = vst.msk [vmem:[%s2650_s29 + $0x18] sm:$0x1] %vm876_vm12, %v1365_v5 }
 0x398   : > { %v1459_v39 = vpop.permute.xlu0 %1458  ;;  %1436 = vrot.lane.b32.xlu1 %v2809_v13, %s2192_s19 }
 0x399   : > { %1482 = vst.msk [vmem:[%s2650_s29 + $0xb] sm:$0x1] %vm876_vm12, %v1459_v39 }
 0x39a   : > { %v1397_v35 = vpop.permute.xlu1 %1396  ;;  %1526 = vrot.lane.b32.xlu0 %v2751_v19, %s2195_s26 }
 0x39b   : > { %1419 = vst.msk [vmem:[%s2650_s29 + $0x19] sm:$0x1] %vm876_vm12, %v1397_v35 }
 0x39c   : > { %v1491_v8 = vpop.permute.xlu0 %1490  ;;  %1464 = vrot.lane.b32.xlu1 %v2791_v6, %s2193_s4 }
 0x39d   : > { %1514 = vst.msk [vmem:[%s2650_s29 + $0xc] sm:$0x1] %vm876_vm12, %v1491_v8 }
 0x39e   : > { %v1429_v53 = vpop.permute.xlu1 %1428  ;;  %1530 = vrot.lane.b32.xlu0 %v2774_v59, %s2195_s26 }
 0x39f   : > { %1451 = vst.msk [vmem:[%s2650_s29 + $0x1a] sm:$0x1] %vm876_vm12, %v1429_v53  ;;  %v3551_v53 = vrot.slane %v2879_v42, %v2739_v48 }
 0x3a0   : > { %v1523_v9 = vpop.permute.xlu0 %1522  ;;  %1468 = vrot.lane.b32.xlu1 %v2809_v13, %s2193_s4 }
 0x3a1   : > { %1546 = vst.msk [vmem:[%s2650_s29 + $0xd] sm:$0x1] %vm876_vm12, %v1523_v9 }
 0x3a2   : > { %v1461_v19 = vpop.permute.xlu1 %1460  ;;  %929 = vrot.lane.b32.xlu0 %v2802_v10, %s2176_s8 }
 0x3a3   : > { %1483 = vst.msk [vmem:[%s2650_s29 + $0x1b] sm:$0x1] %vm876_vm12, %v1461_v19 }
 0x3a4   : > { %v922_v41 = vpop.permute.xlu0 %921  ;;  %1496 = vrot.lane.b32.xlu1 %v2791_v6, %s2194_s22 }
 0x3a5   : > { %943 = vst.msk [vmem:[%s2650_s29 + $0x21] sm:$0x1] %vm876_vm12, %v922_v41 }
 0x3a6   : > { %v1493_v59 = vpop.permute.xlu1 %1492  ;;  %961 = vrot.lane.b32.xlu0 %v2802_v10, %s2179_s20 }
 0x3a7   : > { %1515 = vst.msk [vmem:[%s2650_s29 + $0x1c] sm:$0x1] %vm876_vm12, %v1493_v59 }
 0x3a8   : > { %v926_v49 = vpop.permute.xlu0 %925  ;;  %1500 = vrot.lane.b32.xlu1 %v2809_v13, %s2194_s22 }
 0x3a9   : > { %945 = vst.msk [vmem:[%s2650_s29 + $0x41] sm:$0x1] %vm876_vm12, %v926_v49 }
 0x3aa   : > { %v1525_v50 = vpop.permute.xlu1 %1524  ;;  %993 = vrot.lane.b32.xlu0 %v2802_v10, %s2185_s9 }
 0x3ab   : > { %1547 = vst.msk [vmem:[%s2650_s29 + $0x1d] sm:$0x1] %vm876_vm12, %v1525_v50 }
 0x3ac   : > { %v954_v37 = vpop.permute.xlu0 %953  ;;  %1675 = vrot.lane.b32.xlu1 %v1620_v45, %s2196_s27 }
 0x3ad   : > { %975 = vst.msk [vmem:[%s2650_s29 + $0x22] sm:$0x1] %vm876_vm12, %v954_v37 }
 0x3ae   : > { %v3149_v43 = vpop.permute.xlu1 %1671  ;;  %1025 = vrot.lane.b32.xlu0 %v2802_v10, %s2186_s10 }
 0x3b0   : > { %v958_v1 = vpop.permute.xlu0 %957  ;;  %1679 = vrot.lane.b32.xlu1 %v1628_v18, %s2196_s27 }
 0x3b1   : > { %977 = vst.msk [vmem:[%s2650_s29 + $0x42] sm:$0x1] %vm876_vm12, %v958_v1 }
 0x3b2   : > { %v3159_v62 = vpop.permute.xlu1 %1687  ;;  %1057 = vrot.lane.b32.xlu0 %v2802_v10, %s2187_s11 }
 0x3b4   : > { %v986_v45 = vpop.permute.xlu0 %985  ;;  %1691 = vrot.lane.b32.xlu1 %v1652_v32, %s2196_s27 }
 0x3b5   : > { %1007 = vst.msk [vmem:[%s2650_s29 + $0x23] sm:$0x1] %vm876_vm12, %v986_v45 }
 0x3b6   : > { %v924_v24 = vpop.permute.xlu1 %923  ;;  %1089 = vrot.lane.b32.xlu0 %v2802_v10, %s2188_s6 }
 0x3b7   : > { %944 = vst.msk [vmem:[%s2650_s29 + $0x31] sm:$0x1] %vm876_vm12, %v924_v24 }
 0x3b8   : > { %v990_v18 = vpop.permute.xlu0 %989  ;;  %1695 = vrot.lane.b32.xlu1 %v1660_v26, %s2196_s27 }
 0x3b9   : > { %1009 = vst.msk [vmem:[%s2650_s29 + $0x43] sm:$0x1] %vm876_vm12, %v990_v18 }
 0x3ba   : > { %1228 = vrot.lane.b32.xlu0 %v1171_v16, %s2190_s23  ;;  %v928_v32 = vpop.permute.xlu1 %927 }
 0x3bb   : > { %946 = vst.msk [vmem:[%s2650_s29 + $0x51] sm:$0x1] %vm876_vm12, %v928_v32 }
 0x3bc   : > { %v1018_v10 = vpop.permute.xlu0 %1017  ;;  %1528 = vrot.lane.b32.xlu1 %v2791_v6, %s2195_s26 }
 0x3bd   : > { %1039 = vst.msk [vmem:[%s2650_s29 + $0x24] sm:$0x1] %vm876_vm12, %v1018_v10 }
 0x3be   : > { %1232 = vrot.lane.b32.xlu0 %v1179_v20, %s2190_s23  ;;  %v956_v26 = vpop.permute.xlu1 %955 }
 0x3bf   : > { %976 = vst.msk [vmem:[%s2650_s29 + $0x32] sm:$0x1] %vm876_vm12, %v956_v26 }
 0x3c0   : > { %v1022_v46 = vpop.permute.xlu0 %1021  ;;  %1532 = vrot.lane.b32.xlu1 %v2809_v13, %s2195_s26 }
 0x3c1   : > { %1041 = vst.msk [vmem:[%s2650_s29 + $0x44] sm:$0x1] %vm876_vm12, %v1022_v46 }
 0x3c2   : > { %1244 = vrot.lane.b32.xlu0 %v1203_v25, %s2190_s23  ;;  %v960_v6 = vpop.permute.xlu1 %959 }
 0x3c3   : > { %978 = vst.msk [vmem:[%s2650_s29 + $0x52] sm:$0x1] %vm876_vm12, %v960_v6 }
 0x3c4   : > { %v1050_v55 = vpop.permute.xlu0 %1049  ;;  %931 = vrot.lane.b32.xlu1 %v2835_v27, %s2176_s8  ;;  %s1944_s8 = sshll.u32 %s2241_s16, 11  ;;  %s1840_s16 = scalar_lea.sflag [#allocation6], %s2324_s5 }
 0x3c5   : > { %1071 = vst.msk [vmem:[%s2650_s29 + $0x25] sm:$0x1] %vm876_vm12, %v1050_v55 }
 0x3c6   : > { %1248 = vrot.lane.b32.xlu0 %v1211_v30, %s2190_s23  ;;  %v988_v13 = vpop.permute.xlu1 %987 }
 0x3c7   : > { %1008 = vst.msk [vmem:[%s2650_s29 + $0x33] sm:$0x1] %vm876_vm12, %v988_v13 }
 0x3c8   : > { %v1054_v56 = vpop.permute.xlu0 %1053  ;;  %963 = vrot.lane.b32.xlu1 %v2835_v27, %s2179_s20  ;;  %s1853_s20 = sshll.u32 %s2650_s29, 4  ;;  %s3488_s20 = int_to_ptr.vmem [resolvable:$true] %s1853_s20 }
 0x3c9   : > { %1073 = vst.msk [vmem:[%s2650_s29 + $0x45] sm:$0x1] %vm876_vm12, %v1054_v56 }
 0x3ca   : > { %1374 = vrot.lane.b32.xlu0 %v2852_v38, %s2189_s7  ;;  %v992_v16 = vpop.permute.xlu1 %991 }
 0x3cb   : > { %1010 = vst.msk [vmem:[%s2650_s29 + $0x53] sm:$0x1] %vm876_vm12, %v992_v16 }
 0x3cc   : > { %v1082_v20 = vpop.permute.xlu0 %1081  ;;  %995 = vrot.lane.b32.xlu1 %v2835_v27, %s2185_s9  ;;  %s3486_s9 = scalar_lea.hbm %s3539_s3, %s1944_s8 }
 0x3cd   : > { %1103 = vst.msk [vmem:[%s2650_s29 + $0x26] sm:$0x1] %vm876_vm12, %v1082_v20 }
 0x3ce   : > { %1406 = vrot.lane.b32.xlu0 %v2852_v38, %s2191_s17  ;;  %v1020_v57 = vpop.permute.xlu1 %1019 }
 0x3cf   : > { %1040 = vst.msk [vmem:[%s2650_s29 + $0x34] sm:$0x1] %vm876_vm12, %v1020_v57 }
 0x3d0   : > { %v1086_v25 = vpop.permute.xlu0 %1085  ;;  %1027 = vrot.lane.b32.xlu1 %v2835_v27, %s2186_s10  ;;  %s2085_s10 = scalar_lea.vmem %s3488_s20, 2048 }
 0x3d1   : > { %1105 = vst.msk [vmem:[%s2650_s29 + $0x46] sm:$0x1] %vm876_vm12, %v1086_v25  ;;  %p2086_p6 = scmp.ne.s32.totalorder %s3488_s20, %s2085_s10 }
 0x3d2   : > { %1438 = vrot.lane.b32.xlu0 %v2852_v38, %s2192_s19  ;;  %v1024_v30 = vpop.permute.xlu1 %1023 }
 0x3d3   : > { %1042 = vst.msk [vmem:[%s2650_s29 + $0x54] sm:$0x1] %vm876_vm12, %v1024_v30  ;;  %p2087_p12 = pnand %p2086_p6, %p3552_p11 }
 0x3d4   : > { %v1225_v0 = vpop.permute.xlu0 %1224  ;;  %1059 = vrot.lane.b32.xlu1 %v2835_v27, %s2187_s11  ;;  %s2197_s11 = smov [#allocation7]  }
 0x3d5   : > { %v1257_v63 = vsel %vm1256_vm13, %v1225_v0, %v3079_v33  ;;  %p2088_p13 = pneg %p2087_p12 }
 0x3d6   : > { %1273 = vst.msk [vmem:[%s2650_s29 + $0x7] sm:$0x1] %vm876_vm12, %v1257_v63  ;;  %1470 = vrot.lane.b32.xlu0 %v2852_v38, %s2193_s4  ;;  %v1052_v3 = vpop.permute.xlu1 %1051 }
 0x3d7   : > { %1072 = vst.msk [vmem:[%s2650_s29 + $0x35] sm:$0x1] %vm876_vm12, %v1052_v3 }
 0x3d8   : > { %v1241_v47 = vpop.permute.xlu0 %1240  ;;  %1091 = vrot.lane.b32.xlu1 %v2835_v27, %s2188_s6  ;;  %s2089_s6 = sshll.u32 %s2197_s11, 4  ;;  %s2090_s6 = int_to_ptr.vmem [resolvable:$false] %s2089_s6 }
 0x3d9   : > { %v1261_v2 = vsel %vm1256_vm13, %v1241_v47, %v3087_v14  ;;  %p2092_p8 = scmp.lt.s32.totalorder %s3488_s20, %s2090_s6 }
 0x3da   : > { %1277 = vst.msk [vmem:[%s2650_s29 + $0x47] sm:$0x1] %vm876_vm12, %v1261_v2  ;;  %1502 = vrot.lane.b32.xlu0 %v2852_v38, %s2194_s22  ;;  %v1056_v4 = vpop.permute.xlu1 %1055 }
 0x3db   : > { %1074 = vst.msk [vmem:[%s2650_s29 + $0x55] sm:$0x1] %vm876_vm12, %v1056_v4 }
 0x3dc   : > { %v1367_v29 = vpop.permute.xlu0 %1366  ;;  %1238 = vrot.lane.b32.xlu1 %v1191_v52, %s2190_s23  ;;  %v3546_v52 = vrot.slane %v2806_v11, %v2619_v54 }
 0x3dd   : > { %1388 = vst.msk [vmem:[%s2650_s29 + $0x28] sm:$0x1] %vm876_vm12, %v1367_v29 }
 0x3de   : > { %1673 = vrot.lane.b32.xlu0 %v1616_v17, %s2196_s27  ;;  %v1084_v27 = vpop.permute.xlu1 %1083 }
 0x3df   : > { %1104 = vst.msk [vmem:[%s2650_s29 + $0x36] sm:$0x1] %vm876_vm12, %v1084_v27 }
 0x3e0   : > { %v1371_v28 = vpop.permute.xlu0 %1370  ;;  %1254 = vrot.lane.b32.xlu1 %v1223_v12, %s2190_s23  ;;  %v3547_v12 = vrot.slane %v2827_v23, %v2619_v54 }
 0x3e1   : > { %1390 = vst.msk [vmem:[%s2650_s29 + $0x48] sm:$0x1] %vm876_vm12, %v1371_v28 }
 0x3e2   : > { %1677 = vrot.lane.b32.xlu0 %v3546_v52, %s2196_s27  ;;  %v1088_v21 = vpop.permute.xlu1 %1087 }
 0x3e3   : > { %1106 = vst.msk [vmem:[%s2650_s29 + $0x56] sm:$0x1] %vm876_vm12, %v1088_v21 }
 0x3e4   : > { %v1399_v17 = vpop.permute.xlu0 %1398  ;;  %1376 = vrot.lane.b32.xlu1 %v2873_v7, %s2189_s7  ;;  %s2091_s7 = scalar_lea.vmem %s2090_s6, 4096 }
 0x3e5   : > { %1420 = vst.msk [vmem:[%s2650_s29 + $0x29] sm:$0x1] %vm876_vm12, %v1399_v17  ;;  %p2093_p10 = scmp.lt.s32.totalorder %s2091_s7, %s2085_s10 }
 0x3e6   : > { %1689 = vrot.lane.b32.xlu0 %v3547_v12, %s2196_s27  ;;  %v3291_v33 = vpop.permute.xlu1 %1230 }
 0x3e7   : > { %p2094_p0 = por %p2093_p10, %p2092_p8 }
 0x3e8   : > { %v1403_v11 = vpop.permute.xlu0 %1402  ;;  %1408 = vrot.lane.b32.xlu1 %v2873_v7, %s2191_s17 }
 0x3e9   : > { %1422 = vst.msk [vmem:[%s2650_s29 + $0x49] sm:$0x1] %vm876_vm12, %v1403_v11  ;;  %p2095_p2 = pnand %p2094_p0, %p2088_p13 }
 0x3ea   : > { %1693 = vrot.lane.b32.xlu0 %v3548_v34, %s2196_s27  ;;  %v3301_v14 = vpop.permute.xlu1 %1234 }
 0x3ec   : > { %v1431_v60 = vpop.permute.xlu0 %1430  ;;  %1440 = vrot.lane.b32.xlu1 %v2873_v7, %s2192_s19 }
 0x3ed   : > { %1452 = vst.msk [vmem:[%s2650_s29 + $0x2a] sm:$0x1] %vm876_vm12, %v1431_v60 }
 0x3ee   : > { %1534 = vrot.lane.b32.xlu0 %v2852_v38, %s2195_s26  ;;  %v3309_v23 = vpop.permute.xlu1 %1246  ;;  %v3550_v38 = vrot.slane %v2856_v40, %v2619_v54 }
 0x3f0   : > { %v1435_v5 = vpop.permute.xlu0 %1434  ;;  %1472 = vrot.lane.b32.xlu1 %v2873_v7, %s2193_s4 }
 0x3f1   : > { %1454 = vst.msk [vmem:[%s2650_s29 + $0x4a] sm:$0x1] %vm876_vm12, %v1435_v5 }
 0x3f2   : > { %1236 = vrot.lane.b32.xlu0 %v3549_v15, %s2190_s23  ;;  %v3319_v39 = vpop.permute.xlu1 %1250 }
 0x3f4   : > { %v1463_v35 = vpop.permute.xlu0 %1462  ;;  %1504 = vrot.lane.b32.xlu1 %v2873_v7, %s2194_s22 }
 0x3f5   : > { %1484 = vst.msk [vmem:[%s2650_s29 + $0x2b] sm:$0x1] %vm876_vm12, %v1463_v35 }
 0x3f6   : > { %1252 = vrot.lane.b32.xlu0 %v3550_v38, %s2190_s23  ;;  %v1369_v8 = vpop.permute.xlu1 %1368 }
 0x3f7   : > { %1389 = vst.msk [vmem:[%s2650_s29 + $0x38] sm:$0x1] %vm876_vm12, %v1369_v8 }
 0x3f8   : > { %v1467_v36 = vpop.permute.xlu0 %1466  ;;  %1683 = vrot.lane.b32.xlu1 %v3551_v53, %s2196_s27 }
 0x3f9   : > { %1486 = vst.msk [vmem:[%s2650_s29 + $0x4b] sm:$0x1] %vm876_vm12, %v1467_v36 }
 0x3fa   : > { %1681 = vrot.lane.b32.xlu0 %v1632_v22, %s2196_s27  ;;  %v1373_v40 = vpop.permute.xlu1 %1372 }
 0x3fb   : > { %1391 = vst.msk [vmem:[%s2650_s29 + $0x58] sm:$0x1] %vm876_vm12, %v1373_v40 }
 0x3fc   : > { %v1495_v9 = vpop.permute.xlu0 %1494  ;;  %1699 = vrot.lane.b32.xlu1 %v1668_v51, %s2196_s27 }
 0x3fd   : > { %1516 = vst.msk [vmem:[%s2650_s29 + $0x2c] sm:$0x1] %vm876_vm12, %v1495_v9 }
 0x3fe   : > { %1697 = vrot.lane.b32.xlu0 %v1664_v58, %s2196_s27  ;;  %v1401_v42 = vpop.permute.xlu1 %1400 }
 0x3ff   : > { %1421 = vst.msk [vmem:[%s2650_s29 + $0x39] sm:$0x1] %vm876_vm12, %v1401_v42 }
 0x400   : > { %v1499_v22 = vpop.permute.xlu0 %1498  ;;  %1536 = vrot.lane.b32.xlu1 %v2873_v7, %s2195_s26 }
 0x401   : > { %1518 = vst.msk [vmem:[%s2650_s29 + $0x4c] sm:$0x1] %vm876_vm12, %v1499_v22 }
 0x402   : > { %1819 = vrot.lane.b32.xlu0 %v2893_v44, %s2184_s30  ;;  %v1405_v48 = vpop.permute.xlu1 %1404 }
 0x403   : > { %1423 = vst.msk [vmem:[%s2650_s29 + $0x59] sm:$0x1] %vm876_vm12, %v1405_v48 }
 0x404   : > { %v1670_v54 = vpop.permute.xlu0 %1669  ;;  %1821 = vrot.lane.b32.xlu1 %v2896_v31, %s2184_s30 }
 0x405   : > { %v1702_v61 = vsel %vm1701_vm14, %v1670_v54, %v3149_v43 }
 0x406   : > { %1718 = vst.msk [vmem:[%s2650_s29 + $0xe] sm:$0x1] %vm876_vm12, %v1702_v61  ;;  %v1433_v7 = vpop.permute.xlu1 %1432 }
 0x407   : > { %1453 = vst.msk [vmem:[%s2650_s29 + $0x3a] sm:$0x1] %vm876_vm12, %v1433_v7 }
 0x408   : > { %v1686_v44 = vpop.permute.xlu0 %1685 }
 0x409   : > { %v1706_v51 = vsel %vm1701_vm14, %v1686_v44, %v3159_v62 }
 0x40a   : > { %1722 = vst.msk [vmem:[%s2650_s29 + $0x4e] sm:$0x1] %vm876_vm12, %v1706_v51  ;;  %v1437_v58 = vpop.permute.xlu1 %1436 }
 0x40b   : > { %1455 = vst.msk [vmem:[%s2650_s29 + $0x5a] sm:$0x1] %vm876_vm12, %v1437_v58 }
 0x40c   : > { %v1527_v31 = vpop.permute.xlu0 %1526 }
 0x40d   : > { %1548 = vst.msk [vmem:[%s2650_s29 + $0x2d] sm:$0x1] %vm876_vm12, %v1527_v31 }
 0x40e   : > { %v1465_v19 = vpop.permute.xlu1 %1464 }
 0x40f   : > { %1485 = vst.msk [vmem:[%s2650_s29 + $0x3b] sm:$0x1] %vm876_vm12, %v1465_v19 }
 0x410   : > { %v1531_v41 = vpop.permute.xlu0 %1530 }
 0x411   : > { %1550 = vst.msk [vmem:[%s2650_s29 + $0x4d] sm:$0x1] %vm876_vm12, %v1531_v41 }
 0x412   : > { %v1469_v59 = vpop.permute.xlu1 %1468 }
 0x413   : > { %1487 = vst.msk [vmem:[%s2650_s29 + $0x5b] sm:$0x1] %vm876_vm12, %v1469_v59 }
 0x414   : > { %v930_v49 = vpop.permute.xlu0 %929 }
 0x415   : > { %947 = vst.msk [vmem:[%s2650_s29 + $0x61] sm:$0x1] %vm876_vm12, %v930_v49 }
 0x416   : > { %v1497_v50 = vpop.permute.xlu1 %1496 }
 0x417   : > { %1517 = vst.msk [vmem:[%s2650_s29 + $0x3c] sm:$0x1] %vm876_vm12, %v1497_v50 }
 0x418   : > { %v962_v37 = vpop.permute.xlu0 %961 }
 0x419   : > { %979 = vst.msk [vmem:[%s2650_s29 + $0x62] sm:$0x1] %vm876_vm12, %v962_v37 }
 0x41a   : > { %v1501_v43 = vpop.permute.xlu1 %1500 }
 0x41b   : > { %1519 = vst.msk [vmem:[%s2650_s29 + $0x5c] sm:$0x1] %vm876_vm12, %v1501_v43 }
 0x41c   : > { %v994_v1 = vpop.permute.xlu0 %993 }
 0x41d   : > { %1011 = vst.msk [vmem:[%s2650_s29 + $0x63] sm:$0x1] %vm876_vm12, %v994_v1 }
 0x41e   : > { %v1676_v62 = vpop.permute.xlu1 %1675 }
 0x420   : > { %v1026_v45 = vpop.permute.xlu0 %1025 }
 0x421   : > { %1043 = vst.msk [vmem:[%s2650_s29 + $0x64] sm:$0x1] %vm876_vm12, %v1026_v45 }
 0x422   : > { %v1680_v24 = vpop.permute.xlu1 %1679 }
 0x424   : > { %v1058_v18 = vpop.permute.xlu0 %1057 }
 0x425   : > { %1075 = vst.msk [vmem:[%s2650_s29 + $0x65] sm:$0x1] %vm876_vm12, %v1058_v18 }
 0x426   : > { %v1692_v32 = vpop.permute.xlu1 %1691 }
 0x428   : > { %v1090_v10 = vpop.permute.xlu0 %1089 }
 0x429   : > { %1107 = vst.msk [vmem:[%s2650_s29 + $0x66] sm:$0x1] %vm876_vm12, %v1090_v10 }
 0x42a   : > { %v1696_v26 = vpop.permute.xlu1 %1695 }
 0x42c   : > { %v1229_v46 = vpop.permute.xlu0 %1228 }
 0x42d   : > { %v1258_v6 = vsel %vm1256_vm13, %v1229_v46, %v3291_v33 }
 0x42e   : > { %1274 = vst.msk [vmem:[%s2650_s29 + $0x17] sm:$0x1] %vm876_vm12, %v1258_v6  ;;  %v1529_v55 = vpop.permute.xlu1 %1528 }
 0x42f   : > { %1549 = vst.msk [vmem:[%s2650_s29 + $0x3d] sm:$0x1] %vm876_vm12, %v1529_v55 }
 0x430   : > { %v1233_v13 = vpop.permute.xlu0 %1232 }
 0x431   : > { %v1259_v56 = vsel %vm1256_vm13, %v1233_v13, %v3301_v14 }
 0x432   : > { %1275 = vst.msk [vmem:[%s2650_s29 + $0x27] sm:$0x1] %vm876_vm12, %v1259_v56  ;;  %v1533_v16 = vpop.permute.xlu1 %1532 }
 0x433   : > { %1551 = vst.msk [vmem:[%s2650_s29 + $0x5d] sm:$0x1] %vm876_vm12, %v1533_v16 }
 0x434   : > { %v1245_v20 = vpop.permute.xlu0 %1244 }
 0x435   : > { %v1262_v57 = vsel %vm1256_vm13, %v1245_v20, %v3309_v23 }
 0x436   : > { %1278 = vst.msk [vmem:[%s2650_s29 + $0x57] sm:$0x1] %vm876_vm12, %v1262_v57  ;;  %v932_v25 = vpop.permute.xlu1 %931 }
 0x437   : > { %948 = vst.msk [vmem:[%s2650_s29 + $0x71] sm:$0x1] %vm876_vm12, %v932_v25 }
 0x438   : > { %v1249_v30 = vpop.permute.xlu0 %1248 }
 0x439   : > { %v1263_v0 = vsel %vm1256_vm13, %v1249_v30, %v3319_v39 }
 0x43a   : > { %1279 = vst.msk [vmem:[%s2650_s29 + $0x67] sm:$0x1] %vm876_vm12, %v1263_v0  ;;  %v964_v63 = vpop.permute.xlu1 %963 }
 0x43b   : > { %980 = vst.msk [vmem:[%s2650_s29 + $0x72] sm:$0x1] %vm876_vm12, %v964_v63 }
 0x43c   : > { %v1375_v3 = vpop.permute.xlu0 %1374 }
 0x43d   : > { %1392 = vst.msk [vmem:[%s2650_s29 + $0x68] sm:$0x1] %vm876_vm12, %v1375_v3 }
 0x43e   : > { %v996_v47 = vpop.permute.xlu1 %995 }
 0x43f   : > { %1012 = vst.msk [vmem:[%s2650_s29 + $0x73] sm:$0x1] %vm876_vm12, %v996_v47 }
 0x440   : > { %v1407_v2 = vpop.permute.xlu0 %1406 }
 0x441   : > { %1424 = vst.msk [vmem:[%s2650_s29 + $0x69] sm:$0x1] %vm876_vm12, %v1407_v2 }
 0x442   : > { %v1028_v4 = vpop.permute.xlu1 %1027 }
 0x443   : > { %1044 = vst.msk [vmem:[%s2650_s29 + $0x74] sm:$0x1] %vm876_vm12, %v1028_v4 }
 0x444   : > { %v1439_v29 = vpop.permute.xlu0 %1438 }
 0x445   : > { %1456 = vst.msk [vmem:[%s2650_s29 + $0x6a] sm:$0x1] %vm876_vm12, %v1439_v29 }
 0x446   : > { %v1060_v27 = vpop.permute.xlu1 %1059 }
 0x447   : > { %1076 = vst.msk [vmem:[%s2650_s29 + $0x75] sm:$0x1] %vm876_vm12, %v1060_v27 }
 0x448   : > { %v1471_v28 = vpop.permute.xlu0 %1470 }
 0x449   : > { %1488 = vst.msk [vmem:[%s2650_s29 + $0x6b] sm:$0x1] %vm876_vm12, %v1471_v28 }
 0x44a   : > { %v1092_v52 = vpop.permute.xlu1 %1091 }
 0x44b   : > { %1108 = vst.msk [vmem:[%s2650_s29 + $0x76] sm:$0x1] %vm876_vm12, %v1092_v52 }
 0x44c   : > { %v1503_v21 = vpop.permute.xlu0 %1502 }
 0x44d   : > { %1520 = vst.msk [vmem:[%s2650_s29 + $0x6c] sm:$0x1] %vm876_vm12, %v1503_v21 }
 0x44e   : > { %v1239_v17 = vpop.permute.xlu1 %1238 }
 0x450   : > { %v1674_v12 = vpop.permute.xlu0 %1673 }
 0x451   : > { %v1703_v33 = vsel %vm1701_vm14, %v1674_v12, %v1676_v62 }
 0x452   : > { %1719 = vst.msk [vmem:[%s2650_s29 + $0x1e] sm:$0x1] %vm876_vm12, %v1703_v33  ;;  %v1255_v11 = vpop.permute.xlu1 %1254 }
 0x454   : > { %v1678_v34 = vpop.permute.xlu0 %1677 }
 0x455   : > { %v1704_v14 = vsel %vm1701_vm14, %v1678_v34, %v1680_v24 }
 0x456   : > { %1720 = vst.msk [vmem:[%s2650_s29 + $0x2e] sm:$0x1] %vm876_vm12, %v1704_v14  ;;  %v1377_v60 = vpop.permute.xlu1 %1376 }
 0x457   : > { %1393 = vst.msk [vmem:[%s2650_s29 + $0x78] sm:$0x1] %vm876_vm12, %v1377_v60 }
 0x458   : > { %v1690_v23 = vpop.permute.xlu0 %1689 }
 0x459   : > { %v1707_v5 = vsel %vm1701_vm14, %v1690_v23, %v1692_v32 }
 0x45a   : > { %1723 = vst.msk [vmem:[%s2650_s29 + $0x5e] sm:$0x1] %vm876_vm12, %v1707_v5  ;;  %v1409_v15 = vpop.permute.xlu1 %1408 }
 0x45b   : > { %1425 = vst.msk [vmem:[%s2650_s29 + $0x79] sm:$0x1] %vm876_vm12, %v1409_v15 }
 0x45c   : > { %v1694_v39 = vpop.permute.xlu0 %1693 }
 0x45d   : > { %v1708_v35 = vsel %vm1701_vm14, %v1694_v39, %v1696_v26 }
 0x45e   : > { %1724 = vst.msk [vmem:[%s2650_s29 + $0x6e] sm:$0x1] %vm876_vm12, %v1708_v35  ;;  %v1441_v38 = vpop.permute.xlu1 %1440 }
 0x45f   : > { %1457 = vst.msk [vmem:[%s2650_s29 + $0x7a] sm:$0x1] %vm876_vm12, %v1441_v38 }
 0x460   : > { %v1535_v8 = vpop.permute.xlu0 %1534 }
 0x461   : > { %1552 = vst.msk [vmem:[%s2650_s29 + $0x6d] sm:$0x1] %vm876_vm12, %v1535_v8 }
 0x462   : > { %v1473_v36 = vpop.permute.xlu1 %1472 }
 0x463   : > { %1489 = vst.msk [vmem:[%s2650_s29 + $0x7b] sm:$0x1] %vm876_vm12, %v1473_v36 }
 0x464   : > { %v1237_v53 = vpop.permute.xlu0 %1236 }
 0x465   : > { %v1260_v40 = vsel %vm1256_vm13, %v1237_v53, %v1239_v17 }
 0x466   : > { %1276 = vst.msk [vmem:[%s2650_s29 + $0x37] sm:$0x1] %vm876_vm12, %v1260_v40  ;;  %v1505_v9 = vpop.permute.xlu1 %1504 }
 0x467   : > { %1521 = vst.msk [vmem:[%s2650_s29 + $0x7c] sm:$0x1] %vm876_vm12, %v1505_v9 }
 0x468   : > { %v1253_v42 = vpop.permute.xlu0 %1252 }
 0x469   : > { %v1264_v22 = vsel %vm1256_vm13, %v1253_v42, %v1255_v11 }
 0x46a   : > { %1280 = vst.msk [vmem:[%s2650_s29 + $0x77] sm:$0x1] %vm876_vm12, %v1264_v22  ;;  %v1684_v48 = vpop.permute.xlu1 %1683 }
 0x46c   : > { %v1682_v54 = vpop.permute.xlu0 %1681 }
 0x46d   : > { %v1705_v61 = vsel %vm1701_vm14, %v1682_v54, %v1684_v48 }
 0x46e   : > { %1721 = vst.msk [vmem:[%s2650_s29 + $0x3e] sm:$0x1] %vm876_vm12, %v1705_v61  ;;  %v1700_v7 = vpop.permute.xlu1 %1699 }
 0x470   : > { %v1698_v44 = vpop.permute.xlu0 %1697 }
 0x471   : > { %v1709_v51 = vsel %vm1701_vm14, %v1698_v44, %v1700_v7 }
 0x472   : > { %1725 = vst.msk [vmem:[%s2650_s29 + $0x7e] sm:$0x1] %vm876_vm12, %v1709_v51  ;;  %v1537_v58 = vpop.permute.xlu1 %1536 }
 0x473   : > { %1553 = vst.msk [vmem:[%s2650_s29 + $0x7d] sm:$0x1] %vm876_vm12, %v1537_v58 }
 0x474   : > { %v1820_v31 = vpop.permute.xlu0 %1819 }
 0x475   : > { %1837 = vst.msk [vmem:[%s2650_s29 + $0x6f] sm:$0x1] %vm876_vm12, %v1820_v31 }
 0x476   : > { %v1822_v19 = vpop.permute.xlu1 %1821 }
 0x477   : > { %1838 = vst.msk [vmem:[%s2650_s29 + $0x7f] sm:$0x1] %vm876_vm12, %v1822_v19 }
 0x478   : > { %2098 = shalt.err (!%p2095_p2)
}
 0x479   : > { %s2099_s29 = scalar_lea.hbm %s3486_s9, 2048  ;;  %s2103_s19 = scalar_lea.hbm %s3539_s3, 4096 }
 0x47a   : > { %p2100_p4 = scmp.ne.s32.totalorder %s3486_s9, %s2099_s29  ;;  %p2104_p9 = scmp.lt.u32.totalorder %s3486_s9, %s3539_s3 }
 0x47b   : > { %p2105_p1 = scmp.lt.u32.totalorder %s2103_s19, %s2099_s29  ;;  %p2107_p6 = scmp.lt.u32.totalorder %s2099_s29, %s3486_s9 }
 0x47c   : > { %p2101_p5 = pnand %p2100_p4, %p3552_p11 }
 0x47d   : > { %p2106_p3 = por %p2105_p1, %p2104_p9 }
 0x47e   : > { %p2102_p7 = pneg %p2101_p5 }
 0x47f   : > { %p2108_p12 = por %p2107_p6, %p2106_p3 }
 0x481   : > { %p2109_p13 = pnand %p2108_p12, %p2102_p7 }
 0x483   : > { %2112 = shalt.err (!%p2109_p13)
}
 0x484   : > { %s2198_s26 = smov 128   ;;  %s2199_s27 = smov 8  }
 0x485   : > { %1961 = dma.vmem_to_hbm [thread:$0]  (%p3552_p11), %s3488_s20, 2048, %s3486_s9, %s1840_s16, %s2198_s26, %s2198_s26, %s2199_s27  }
 0x486 PF: > { %s1868_s8 = sand.u32 1, %s2139_s12   ;;  %p3553_p8 = scmp.ne.s32.totalorder %s3544_s25, 0 }
 0x487   : > { %p3554_p10 = scmp.ge.s32.totalorder %s2151_s15, 2  ;;  %s1869_s28 = scalar_lea.sflag [#allocation6], %s1868_s8 }
 0x489   : > { %p1968_p0 = pnand %p3554_p10, %p3553_p8 }
 0x48b   : > { %2134 = dma.done.wait (!%p1968_p0), %s1869_s28, 2048  }
 0x48c   : > { %2136 = vsyncadd (!%p1968_p0), %s1869_s28, 4294965248  ;;  %p16_p2 = scmp.ge.s32.totalorder %s2245_s18, 4   ;;  %s3555_s12 = smov %s2143_s13 }
 0x48d   : > { %s3556_s13 = smov %s2147_s14  ;;  %s3557_s14 = smov %s2257_s21 }
 0x48e   : > { %s3558_s15 = smov %s2245_s18  ;;  %18 = sbr.rel (!%p16_p2) target bundleno = 5 (0x5), region = 77 }
 0x495   :  { %1874 = vsyncpa [#allocation5], 1 }
 0x496   :  { %1876 = vsyncpa [#allocation5 + $0x1], 1 }
 0x497   :  { %1877 = vsyncpa [#allocation6], 1 }
 0x498   :  { %1879 = vsyncpa [#allocation6 + $0x1], 1 }

</bundles_post_ra>
